<compile_context>
chip_gen: v6e
topology: v6e:2x2x1
jax: 0.10.0
libtpu: 0.0.40
codegen_flags: <defaults>
</compile_context>

<pallas_src>
import functools

import jax
import jax.numpy as jnp
from jax.experimental import pallas as pl
from jax.experimental.pallas import tpu as pltpu


def _round_up(x, m):
    return ((x + m - 1) // m) * m


# ----------------------------------------------------------------------------
# Kernel
# ----------------------------------------------------------------------------
def _decoder_kernel(n_layers, p_dim, z_ref, p_ref, *refs):
    """Whole MLP forward on one batch tile; weights resident in VMEM.

    refs = (wz, wp, b0, w1, b1, ..., w_{L-1}, b_{L-1}, o_ref)
      z_ref : (TB, latent_pad)   f32
      p_ref : (TB, p_pad)        f32
      wz    : (latent_pad, N0)   bf16   (layer-0 rows for z)
      wp    : (p_pad, N0)        bf16   (layer-0 rows for P)
      b_l   : (1, N_l)           f32    zero-padded
      w_l   : (N_{l-1}, N_l)     bf16   zero-padded
      o_ref : (TB, N_out)        f32    lane-dense padded output
    """
    o_ref = refs[-1]
    params = refs[:-1]
    wz_ref, wp_ref, b0_ref = params[0], params[1], params[2]

    # --- layer 0: fused concat([z, P]) @ W0 + b0 ---
    h = jnp.dot(z_ref[...].astype(jnp.bfloat16), wz_ref[...],
                preferred_element_type=jnp.float32)
    if p_dim == 1:
        # (TB,1) * (1,N0) broadcast on the VPU -- cheaper than a K=1 MXU pass.
        h = h + p_ref[...].astype(jnp.float32) * wp_ref[...].astype(jnp.float32)
    else:
        h = h + jnp.dot(p_ref[...].astype(jnp.bfloat16), wp_ref[...],
                        preferred_element_type=jnp.float32)
    h = h + b0_ref[...]
    if n_layers > 1:
        h = jnp.maximum(h, 0.0)

    # --- remaining layers (padded cols stay exactly 0 -> exact vs reference
    #     up to bf16 operand rounding) ---
    for l in range(1, n_layers):
        w_ref = params[2 * l + 1]
        b_ref = params[2 * l + 2]
        h = jnp.dot(h.astype(jnp.bfloat16), w_ref[...],
                    preferred_element_type=jnp.float32) + b_ref[...]
        if l < n_layers - 1:          # no ReLU on the output layer
            h = jnp.maximum(h, 0.0)

    o_ref[...] = h.astype(o_ref.dtype)


# ----------------------------------------------------------------------------
# One-time parameter packing (hoisted out of the per-forward path)
# ----------------------------------------------------------------------------
def pack_decoder_params(params, latent_dim, p_dim):
    """Pad & pack [(W(in,out), b(1,out)), ...] once. Last pair = output layer."""
    n_layers = len(params)
    s_dim = int(params[-1][0].shape[1])
    latent_pad = _round_up(latent_dim, 8)
    p_pad = p_dim if p_dim == 1 else _round_up(p_dim, 8)

    w0, b0 = params[0]
    n0 = int(w0.shape[1])
    n0_pad = _round_up(n0, 128)
    wz = jnp.zeros((latent_pad, n0_pad), jnp.bfloat16)
    wz = wz.at[:latent_dim, :n0].set(w0[:latent_dim].astype(jnp.bfloat16))
    wp = jnp.zeros((p_pad, n0_pad), jnp.bfloat16)
    wp = wp.at[:p_dim, :n0].set(w0[latent_dim:latent_dim + p_dim].astype(jnp.bfloat16))
    b0p = jnp.zeros((1, n0_pad), jnp.float32)
    b0p = b0p.at[:, :n0].set(jnp.reshape(b0, (1, -1)).astype(jnp.float32))

    layers = [wz, wp, b0p]
    layer_dims = [(latent_dim + p_dim, n0)]
    k_pad = n0_pad
    for l in range(1, n_layers):
        w, b = params[l]
        k, n = int(w.shape[0]), int(w.shape[1])
        n_pad = _round_up(n, 128)
        wpd = jnp.zeros((k_pad, n_pad), jnp.bfloat16).at[:k, :n].set(w.astype(jnp.bfloat16))
        bpd = jnp.zeros((1, n_pad), jnp.float32).at[:, :n].set(
            jnp.reshape(b, (1, -1)).astype(jnp.float32))
        layers += [wpd, bpd]
        layer_dims.append((k, n))
        k_pad = n_pad

    return dict(layers=layers, layer_dims=layer_dims, n_layers=n_layers,
                latent_dim=latent_dim, p_dim=p_dim,
                latent_pad=latent_pad, p_pad=p_pad,
                n_out_pad=k_pad, s_dim=s_dim)


# ----------------------------------------------------------------------------
# XLA fallback for tiny batches (kernel would be pure launch/DMA latency)
# ----------------------------------------------------------------------------
def _forward_packed_jax(z, P, packed):
    layers = packed["layers"]
    n_layers = packed["n_layers"]
    wz, wp, b0 = layers[0], layers[1], layers[2]
    h = (z.astype(jnp.float32) @ wz[:packed["latent_dim"]].astype(jnp.float32)
         + P.astype(jnp.float32) @ wp[:packed["p_dim"]].astype(jnp.float32) + b0)
    if n_layers > 1:
        h = jnp.maximum(h, 0.0)
    for l in range(1, n_layers):
        h = h @ layers[2 * l + 1].astype(jnp.float32) + layers[2 * l + 2]
        if l < n_layers - 1:
            h = jnp.maximum(h, 0.0)
    return h[:, :packed["s_dim"]]


_const_index_map = lambda i: (0, 0)


# ----------------------------------------------------------------------------
# Forward
# ----------------------------------------------------------------------------
def decoder_forward(z, P, packed, *, tb=None, min_pallas_batch=128):
    """Decoder forward. `packed` comes from pack_decoder_params (built once)."""
    B = int(z.shape[0])
    if B < min_pallas_batch:
        return _forward_packed_jax(z, P, packed)

    layers = packed["layers"]
    n_layers = packed["n_layers"]
    p_dim = packed["p_dim"]
    latent_dim = packed["latent_dim"]
    latent_pad, p_pad = packed["latent_pad"], packed["p_pad"]
    n_out_pad, s_dim = packed["n_out_pad"], packed["s_dim"]

    z = z.astype(jnp.float32)
    P = P.astype(jnp.float32)
    if latent_pad != latent_dim:
        z = jnp.pad(z, ((0, 0), (0, latent_pad - latent_dim)))
    if p_pad != p_dim:
        P = jnp.pad(P, ((0, 0), (0, p_pad - p_dim)))

    # Batch tile: multiple of 8, up to 2048 rows, and aiming for >= 2 grid
    # steps so the "parallel" axis can use both TensorCores on v7x.
    if tb is None:
        tb = max(8, min(2048, _round_up(pl.cdiv(B, 2), 8)))
    grid = (pl.cdiv(B, tb),)

    kernel = functools.partial(_decoder_kernel, n_layers, p_dim)

    param_bytes = sum(int(a.size) * a.dtype.itemsize for a in layers)
    flops = 2 * B * sum(k * n for k, n in packed["layer_dims"])
    bytes_accessed = int(4 * (z.size + P.size) + param_bytes + 4 * B * n_out_pad)
    cost = pl.CostEstimate(flops=flops, transcendentals=0,
                           bytes_accessed=bytes_accessed)

    # Explicit VMEM budget: double-buffered activations/output + params
    # (+ headroom for in-kernel intermediates), clamped to safe bounds.
    max_w = max(n_out_pad, max(int(a.shape[-1]) for a in layers))
    act_bytes = 2 * tb * (latent_pad + p_pad + n_out_pad) * 4
    needed = 2 * param_bytes + act_bytes + 6 * tb * max_w * 4
    vmem_limit = int(min(max(needed, 16 << 20), 48 << 20))

    def build(param_mode):
        in_specs = [
            # batch-blocked activations (pipelined per grid step)
            pl.BlockSpec((tb, latent_pad), lambda i: (i, 0)),
            pl.BlockSpec((tb, p_pad), lambda i: (i, 0)),
        ] + [
            # parameters: constant block index -> DMA'd once, VMEM-resident
            pl.BlockSpec(a.shape, _const_index_map, pipeline_mode=param_mode)
            for a in layers
        ]
        return pl.pallas_call(
            kernel,
            out_shape=jax.ShapeDtypeStruct((B, n_out_pad), jnp.float32),
            grid=grid,
            in_specs=in_specs,
            out_specs=pl.BlockSpec((tb, n_out_pad), lambda i: (i, 0)),
            compiler_params=pltpu.CompilerParams(
                dimension_semantics=("parallel",),
                vmem_limit_bytes=vmem_limit),
            cost_estimate=cost,
        )

    try:
        # Constant-index params never re-fetch; single-buffer them.
        out_padded = build(pl.Buffered(1))(z, P, *layers)
    except Exception:
        # Older/newer jax may reject Buffered(1); retry with default buffering.
        out_padded = build(None)(z, P, *layers)

    # Padded columns are exactly zero; slice to the real structure width.
    return out_padded[:, :s_dim]


# ----------------------------------------------------------------------------
# Param init + pure-JAX reference
# ----------------------------------------------------------------------------
def init_decoder_params(key, S_dim, P_dim, latent_dim, hidden_dims):
    """Deterministic init matching the torch module's shapes (W stored (in,out))."""
    params = []
    prev_dim = latent_dim + P_dim
    for h in list(hidden_dims) + [S_dim]:
        key, kw, kb = jax.random.split(key, 3)
        bound = 1.0 / jnp.sqrt(prev_dim)
        w = jax.random.uniform(kw, (prev_dim, h), jnp.float32, -bound, bound)
        b = jax.random.uniform(kb, (1, h), jnp.float32, -bound, bound)
        params.append((w, b))
        prev_dim = h
    return params


def decoder_reference(z, P, params):
    x = jnp.concatenate([z, P], axis=1)
    h = x
    for w, b in params[:-1]:
        h = jnp.maximum(h @ w + b, 0.0)
    w, b = params[-1]
    return h @ w + b


if __name__ == "__main__":
    latent_dim = 16
    P_dim = 1
    S_dim = 4
    hidden_dims = [32, 32]

    key = jax.random.PRNGKey(0)
    key, kz, kp, kparam = jax.random.split(key, 4)
    params = init_decoder_params(kparam, S_dim, P_dim, latent_dim, hidden_dims)
    packed = pack_decoder_params(params, latent_dim, P_dim)   # one-time packing

    # Pallas path: batch big enough for a 2-step "parallel" grid (tb=128).
    B = 256
    z = jax.random.normal(kz, (B, latent_dim), jnp.float32)
    P = jax.random.normal(kp, (B, P_dim), jnp.float32)
    s_hat = jax.block_until_ready(decoder_forward(z, P, packed))
    s_ref = decoder_reference(z, P, params)
    assert s_hat.shape == (B, S_dim)
    # bf16 matmul operands (f32 accumulation) -> loosened tolerance.
    err = float(jnp.max(jnp.abs(s_hat - s_ref)))
    assert jnp.allclose(s_hat, s_ref, atol=5e-2, rtol=5e-2), f"max abs err = {err}"

    # Tiny-batch path (XLA fallback below min_pallas_batch rows).
    s_small = jax.block_until_ready(decoder_forward(z[:8], P[:8], packed))
    assert s_small.shape == (8, S_dim)
    assert jnp.allclose(s_small, s_ref[:8], atol=5e-2, rtol=5e-2)

    print("KERNEL_OK")
</pallas_src>

<mosaic_0001>
module attributes {stable_mosaic.version = 11 : i64} {
  func.func @_decoder_kernel(%arg0: i32, %arg1: memref<128x16xf32, #tpu.memory_space<vmem>>, %arg2: memref<128x1xf32, #tpu.memory_space<vmem>>, %arg3: memref<16x128xbf16, #tpu.memory_space<vmem>>, %arg4: memref<1x128xbf16, #tpu.memory_space<vmem>>, %arg5: memref<1x128xf32, #tpu.memory_space<vmem>>, %arg6: memref<128x128xbf16, #tpu.memory_space<vmem>>, %arg7: memref<1x128xf32, #tpu.memory_space<vmem>>, %arg8: memref<128x128xbf16, #tpu.memory_space<vmem>>, %arg9: memref<1x128xf32, #tpu.memory_space<vmem>>, %arg10: memref<128x128xf32, #tpu.memory_space<vmem>>) attributes {dimension_semantics = [#tpu.dimension_semantics<parallel>], iteration_bounds = array<i64: 2>, scalar_prefetch = 0 : i64, scratch_operands = 0 : i64, tpu.core_type = #tpu.core_type<tc>, window_params = [{transform_indices = @transform_0, window_bounds = array<i64: 128, 16>}, {transform_indices = @transform_1, window_bounds = array<i64: 128, 1>}, {pipeline_mode = #tpu.pipeline_mode<synchronous>, transform_indices = @transform_2, window_bounds = array<i64: 16, 128>}, {pipeline_mode = #tpu.pipeline_mode<synchronous>, transform_indices = @transform_3, window_bounds = array<i64: 1, 128>}, {pipeline_mode = #tpu.pipeline_mode<synchronous>, transform_indices = @transform_4, window_bounds = array<i64: 1, 128>}, {pipeline_mode = #tpu.pipeline_mode<synchronous>, transform_indices = @transform_5, window_bounds = array<i64: 128, 128>}, {pipeline_mode = #tpu.pipeline_mode<synchronous>, transform_indices = @transform_6, window_bounds = array<i64: 1, 128>}, {pipeline_mode = #tpu.pipeline_mode<synchronous>, transform_indices = @transform_7, window_bounds = array<i64: 128, 128>}, {pipeline_mode = #tpu.pipeline_mode<synchronous>, transform_indices = @transform_8, window_bounds = array<i64: 1, 128>}, {transform_indices = @transform_9, window_bounds = array<i64: 128, 128>}]} {
    %c0 = arith.constant 0 : index
    %c0_0 = arith.constant 0 : index
    %0 = vector.load %arg1[%c0, %c0_0] : memref<128x16xf32, #tpu.memory_space<vmem>>, vector<128x16xf32>
    %1 = arith.truncf %0 : vector<128x16xf32> to vector<128x16xbf16>
    %c0_1 = arith.constant 0 : index
    %c0_2 = arith.constant 0 : index
    %2 = vector.load %arg3[%c0_1, %c0_2] : memref<16x128xbf16, #tpu.memory_space<vmem>>, vector<16x128xbf16>
    %cst = arith.constant dense<0.000000e+00> : vector<128x128xf32>
    %3 = tpu.matmul %1, %2, %cst {dimension_numbers = #tpu.dot_dimension_numbers<[1], [0], [0], [1], [0, 0, 1, 1], [], []>} : vector<128x16xbf16>, vector<16x128xbf16>, vector<128x128xf32> -> vector<128x128xf32>
    %c0_3 = arith.constant 0 : index
    %c0_4 = arith.constant 0 : index
    %4 = vector.load %arg2[%c0_3, %c0_4] : memref<128x1xf32, #tpu.memory_space<vmem>>, vector<128x1xf32>
    %c0_5 = arith.constant 0 : index
    %c0_6 = arith.constant 0 : index
    %5 = vector.load %arg4[%c0_5, %c0_6] : memref<1x128xbf16, #tpu.memory_space<vmem>>, vector<1x128xbf16>
    %6 = arith.extf %5 : vector<1x128xbf16> to vector<1x128xf32>
    %7 = vector.broadcast %4 : vector<128x1xf32> to vector<128x128xf32>
    %8 = vector.broadcast %6 : vector<1x128xf32> to vector<128x128xf32>
    %9 = arith.mulf %7, %8 : vector<128x128xf32>
    %10 = arith.addf %3, %9 : vector<128x128xf32>
    %c0_7 = arith.constant 0 : index
    %c0_8 = arith.constant 0 : index
    %11 = vector.load %arg5[%c0_7, %c0_8] : memref<1x128xf32, #tpu.memory_space<vmem>>, vector<1x128xf32>
    %12 = vector.broadcast %11 : vector<1x128xf32> to vector<128x128xf32>
    %13 = arith.addf %10, %12 : vector<128x128xf32>
    %cst_9 = arith.constant 0.000000e+00 : f32
    %14 = vector.broadcast %cst_9 : f32 to vector<128x128xf32>
    %15 = arith.maximumf %13, %14 : vector<128x128xf32>
    %16 = arith.truncf %15 : vector<128x128xf32> to vector<128x128xbf16>
    %c0_10 = arith.constant 0 : index
    %c0_11 = arith.constant 0 : index
    %17 = vector.load %arg6[%c0_10, %c0_11] : memref<128x128xbf16, #tpu.memory_space<vmem>>, vector<128x128xbf16>
    %cst_12 = arith.constant dense<0.000000e+00> : vector<128x128xf32>
    %18 = tpu.matmul %16, %17, %cst_12 {dimension_numbers = #tpu.dot_dimension_numbers<[1], [0], [0], [1], [0, 0, 1, 1], [], []>} : vector<128x128xbf16>, vector<128x128xbf16>, vector<128x128xf32> -> vector<128x128xf32>
    %c0_13 = arith.constant 0 : index
    %c0_14 = arith.constant 0 : index
    %19 = vector.load %arg7[%c0_13, %c0_14] : memref<1x128xf32, #tpu.memory_space<vmem>>, vector<1x128xf32>
    %20 = vector.broadcast %19 : vector<1x128xf32> to vector<128x128xf32>
    %21 = arith.addf %18, %20 : vector<128x128xf32>
    %cst_15 = arith.constant 0.000000e+00 : f32
    %22 = vector.broadcast %cst_15 : f32 to vector<128x128xf32>
    %23 = arith.maximumf %21, %22 : vector<128x128xf32>
    %24 = arith.truncf %23 : vector<128x128xf32> to vector<128x128xbf16>
    %c0_16 = arith.constant 0 : index
    %c0_17 = arith.constant 0 : index
    %25 = vector.load %arg8[%c0_16, %c0_17] : memref<128x128xbf16, #tpu.memory_space<vmem>>, vector<128x128xbf16>
    %cst_18 = arith.constant dense<0.000000e+00> : vector<128x128xf32>
    %26 = tpu.matmul %24, %25, %cst_18 {dimension_numbers = #tpu.dot_dimension_numbers<[1], [0], [0], [1], [0, 0, 1, 1], [], []>} : vector<128x128xbf16>, vector<128x128xbf16>, vector<128x128xf32> -> vector<128x128xf32>
    %c0_19 = arith.constant 0 : index
    %c0_20 = arith.constant 0 : index
    %27 = vector.load %arg9[%c0_19, %c0_20] : memref<1x128xf32, #tpu.memory_space<vmem>>, vector<1x128xf32>
    %28 = vector.broadcast %27 : vector<1x128xf32> to vector<128x128xf32>
    %29 = arith.addf %26, %28 : vector<128x128xf32>
    %c0_21 = arith.constant 0 : index
    %c0_22 = arith.constant 0 : index
    %30 = vector.load %arg10[%c0_21, %c0_22] : memref<128x128xf32, #tpu.memory_space<vmem>>, vector<128x128xf32>
    tpu.vector_store %arg10[%c0_21, %c0_22], %29 {strides = array<i32>} : memref<128x128xf32, #tpu.memory_space<vmem>>, vector<128x128xf32>,
    return
  }
  func.func @transform_0(%arg0: i32) -> (i32, i32) {
    %c0_i32 = arith.constant 0 : i32
    %c0_i32_0 = arith.constant 0 : i32
    return %arg0, %c0_i32 : i32, i32
  }
  func.func @transform_1(%arg0: i32) -> (i32, i32) {
    %c0_i32 = arith.constant 0 : i32
    %c0_i32_0 = arith.constant 0 : i32
    return %arg0, %c0_i32 : i32, i32
  }
  func.func @transform_2(%arg0: i32) -> (i32, i32) {
    %c0_i32 = arith.constant 0 : i32
    %c0_i32_0 = arith.constant 0 : i32
    %c0_i32_1 = arith.constant 0 : i32
    return %c0_i32, %c0_i32_0 : i32, i32
  }
  func.func @transform_3(%arg0: i32) -> (i32, i32) {
    %c0_i32 = arith.constant 0 : i32
    %c0_i32_0 = arith.constant 0 : i32
    %c0_i32_1 = arith.constant 0 : i32
    return %c0_i32, %c0_i32_0 : i32, i32
  }
  func.func @transform_4(%arg0: i32) -> (i32, i32) {
    %c0_i32 = arith.constant 0 : i32
    %c0_i32_0 = arith.constant 0 : i32
    %c0_i32_1 = arith.constant 0 : i32
    return %c0_i32, %c0_i32_0 : i32, i32
  }
  func.func @transform_5(%arg0: i32) -> (i32, i32) {
    %c0_i32 = arith.constant 0 : i32
    %c0_i32_0 = arith.constant 0 : i32
    %c0_i32_1 = arith.constant 0 : i32
    return %c0_i32, %c0_i32_0 : i32, i32
  }
  func.func @transform_6(%arg0: i32) -> (i32, i32) {
    %c0_i32 = arith.constant 0 : i32
    %c0_i32_0 = arith.constant 0 : i32
    %c0_i32_1 = arith.constant 0 : i32
    return %c0_i32, %c0_i32_0 : i32, i32
  }
  func.func @transform_7(%arg0: i32) -> (i32, i32) {
    %c0_i32 = arith.constant 0 : i32
    %c0_i32_0 = arith.constant 0 : i32
    %c0_i32_1 = arith.constant 0 : i32
    return %c0_i32, %c0_i32_0 : i32, i32
  }
  func.func @transform_8(%arg0: i32) -> (i32, i32) {
    %c0_i32 = arith.constant 0 : i32
    %c0_i32_0 = arith.constant 0 : i32
    %c0_i32_1 = arith.constant 0 : i32
    return %c0_i32, %c0_i32_0 : i32, i32
  }
  func.func @transform_9(%arg0: i32) -> (i32, i32) {
    %c0_i32 = arith.constant 0 : i32
    %c0_i32_0 = arith.constant 0 : i32
    return %arg0, %c0_i32 : i32, i32
  }
}

module attributes {stable_mosaic.version = 11 : i64} {
  func.func @_decoder_kernel(%arg0: i32, %arg1: memref<128x16xf32, #tpu.memory_space<vmem>>, %arg2: memref<128x1xf32, #tpu.memory_space<vmem>>, %arg3: memref<16x128xbf16, #tpu.memory_space<vmem>>, %arg4: memref<1x128xbf16, #tpu.memory_space<vmem>>, %arg5: memref<1x128xf32, #tpu.memory_space<vmem>>, %arg6: memref<128x128xbf16, #tpu.memory_space<vmem>>, %arg7: memref<1x128xf32, #tpu.memory_space<vmem>>, %arg8: memref<128x128xbf16, #tpu.memory_space<vmem>>, %arg9: memref<1x128xf32, #tpu.memory_space<vmem>>, %arg10: memref<128x128xf32, #tpu.memory_space<vmem>>) attributes {dimension_semantics = [#tpu.dimension_semantics<parallel>], iteration_bounds = array<i64: 2>, scalar_prefetch = 0 : i64, scratch_operands = 0 : i64, tpu.core_type = #tpu.core_type<tc>, window_params = [{transform_indices = @transform_0, window_bounds = array<i64: 128, 16>}, {transform_indices = @transform_1, window_bounds = array<i64: 128, 1>}, {pipeline_mode = #tpu.pipeline_mode<synchronous>, transform_indices = @transform_2, window_bounds = array<i64: 16, 128>}, {pipeline_mode = #tpu.pipeline_mode<synchronous>, transform_indices = @transform_3, window_bounds = array<i64: 1, 128>}, {pipeline_mode = #tpu.pipeline_mode<synchronous>, transform_indices = @transform_4, window_bounds = array<i64: 1, 128>}, {pipeline_mode = #tpu.pipeline_mode<synchronous>, transform_indices = @transform_5, window_bounds = array<i64: 128, 128>}, {pipeline_mode = #tpu.pipeline_mode<synchronous>, transform_indices = @transform_6, window_bounds = array<i64: 1, 128>}, {pipeline_mode = #tpu.pipeline_mode<synchronous>, transform_indices = @transform_7, window_bounds = array<i64: 128, 128>}, {pipeline_mode = #tpu.pipeline_mode<synchronous>, transform_indices = @transform_8, window_bounds = array<i64: 1, 128>}, {transform_indices = @transform_9, window_bounds = array<i64: 128, 128>}]} {
    %c0 = arith.constant 0 : index
    %c0_0 = arith.constant 0 : index
    %0 = vector.load %arg1[%c0, %c0_0] : memref<128x16xf32, #tpu.memory_space<vmem>>, vector<128x16xf32>
    %1 = arith.truncf %0 : vector<128x16xf32> to vector<128x16xbf16>
    %c0_1 = arith.constant 0 : index
    %c0_2 = arith.constant 0 : index
    %2 = vector.load %arg3[%c0_1, %c0_2] : memref<16x128xbf16, #tpu.memory_space<vmem>>, vector<16x128xbf16>
    %cst = arith.constant dense<0.000000e+00> : vector<128x128xf32>
    %3 = tpu.matmul %1, %2, %cst {dimension_numbers = #tpu.dot_dimension_numbers<[1], [0], [0], [1], [0, 0, 1, 1], [], []>} : vector<128x16xbf16>, vector<16x128xbf16>, vector<128x128xf32> -> vector<128x128xf32>
    %c0_3 = arith.constant 0 : index
    %c0_4 = arith.constant 0 : index
    %4 = vector.load %arg2[%c0_3, %c0_4] : memref<128x1xf32, #tpu.memory_space<vmem>>, vector<128x1xf32>
    %c0_5 = arith.constant 0 : index
    %c0_6 = arith.constant 0 : index
    %5 = vector.load %arg4[%c0_5, %c0_6] : memref<1x128xbf16, #tpu.memory_space<vmem>>, vector<1x128xbf16>
    %6 = arith.extf %5 : vector<1x128xbf16> to vector<1x128xf32>
    %7 = vector.broadcast %4 : vector<128x1xf32> to vector<128x128xf32>
    %8 = vector.broadcast %6 : vector<1x128xf32> to vector<128x128xf32>
    %9 = arith.mulf %7, %8 : vector<128x128xf32>
    %10 = arith.addf %3, %9 : vector<128x128xf32>
    %c0_7 = arith.constant 0 : index
    %c0_8 = arith.constant 0 : index
    %11 = vector.load %arg5[%c0_7, %c0_8] : memref<1x128xf32, #tpu.memory_space<vmem>>, vector<1x128xf32>
    %12 = vector.broadcast %11 : vector<1x128xf32> to vector<128x128xf32>
    %13 = arith.addf %10, %12 : vector<128x128xf32>
    %cst_9 = arith.constant 0.000000e+00 : f32
    %14 = vector.broadcast %cst_9 : f32 to vector<128x128xf32>
    %15 = arith.maximumf %13, %14 : vector<128x128xf32>
    %16 = arith.truncf %15 : vector<128x128xf32> to vector<128x128xbf16>
    %c0_10 = arith.constant 0 : index
    %c0_11 = arith.constant 0 : index
    %17 = vector.load %arg6[%c0_10, %c0_11] : memref<128x128xbf16, #tpu.memory_space<vmem>>, vector<128x128xbf16>
    %cst_12 = arith.constant dense<0.000000e+00> : vector<128x128xf32>
    %18 = tpu.matmul %16, %17, %cst_12 {dimension_numbers = #tpu.dot_dimension_numbers<[1], [0], [0], [1], [0, 0, 1, 1], [], []>} : vector<128x128xbf16>, vector<128x128xbf16>, vector<128x128xf32> -> vector<128x128xf32>
    %c0_13 = arith.constant 0 : index
    %c0_14 = arith.constant 0 : index
    %19 = vector.load %arg7[%c0_13, %c0_14] : memref<1x128xf32, #tpu.memory_space<vmem>>, vector<1x128xf32>
    %20 = vector.broadcast %19 : vector<1x128xf32> to vector<128x128xf32>
    %21 = arith.addf %18, %20 : vector<128x128xf32>
    %cst_15 = arith.constant 0.000000e+00 : f32
    %22 = vector.broadcast %cst_15 : f32 to vector<128x128xf32>
    %23 = arith.maximumf %21, %22 : vector<128x128xf32>
    %24 = arith.truncf %23 : vector<128x128xf32> to vector<128x128xbf16>
    %c0_16 = arith.constant 0 : index
    %c0_17 = arith.constant 0 : index
    %25 = vector.load %arg8[%c0_16, %c0_17] : memref<128x128xbf16, #tpu.memory_space<vmem>>, vector<128x128xbf16>
    %cst_18 = arith.constant dense<0.000000e+00> : vector<128x128xf32>
    %26 = tpu.matmul %24, %25, %cst_18 {dimension_numbers = #tpu.dot_dimension_numbers<[1], [0], [0], [1], [0, 0, 1, 1], [], []>} : vector<128x128xbf16>, vector<128x128xbf16>, vector<128x128xf32> -> vector<128x128xf32>
    %c0_19 = arith.constant 0 : index
    %c0_20 = arith.constant 0 : index
    %27 = vector.load %arg9[%c0_19, %c0_20] : memref<1x128xf32, #tpu.memory_space<vmem>>, vector<1x128xf32>
    %28 = vector.broadcast %27 : vector<1x128xf32> to vector<128x128xf32>
    %29 = arith.addf %26, %28 : vector<128x128xf32>
    %c0_21 = arith.constant 0 : index
    %c0_22 = arith.constant 0 : index
    %30 = vector.load %arg10[%c0_21, %c0_22] : memref<128x128xf32, #tpu.memory_space<vmem>>, vector<128x128xf32>
    tpu.vector_store %arg10[%c0_21, %c0_22], %29 {strides = array<i32>} : memref<128x128xf32, #tpu.memory_space<vmem>>, vector<128x128xf32>,
    return
  }
  func.func @transform_0(%arg0: i32) -> (i32, i32) {
    %c0_i32 = arith.constant 0 : i32
    %c0_i32_0 = arith.constant 0 : i32
    return %arg0, %c0_i32 : i32, i32
  }
  func.func @transform_1(%arg0: i32) -> (i32, i32) {
    %c0_i32 = arith.constant 0 : i32
    %c0_i32_0 = arith.constant 0 : i32
    return %arg0, %c0_i32 : i32, i32
  }
  func.func @transform_2(%arg0: i32) -> (i32, i32) {
    %c0_i32 = arith.constant 0 : i32
    %c0_i32_0 = arith.constant 0 : i32
    %c0_i32_1 = arith.constant 0 : i32
    return %c0_i32, %c0_i32_0 : i32, i32
  }
  func.func @transform_3(%arg0: i32) -> (i32, i32) {
    %c0_i32 = arith.constant 0 : i32
    %c0_i32_0 = arith.constant 0 : i32
    %c0_i32_1 = arith.constant 0 : i32
    return %c0_i32, %c0_i32_0 : i32, i32
  }
  func.func @transform_4(%arg0: i32) -> (i32, i32) {
    %c0_i32 = arith.constant 0 : i32
    %c0_i32_0 = arith.constant 0 : i32
    %c0_i32_1 = arith.constant 0 : i32
    return %c0_i32, %c0_i32_0 : i32, i32
  }
  func.func @transform_5(%arg0: i32) -> (i32, i32) {
    %c0_i32 = arith.constant 0 : i32
    %c0_i32_0 = arith.constant 0 : i32
    %c0_i32_1 = arith.constant 0 : i32
    return %c0_i32, %c0_i32_0 : i32, i32
  }
  func.func @transform_6(%arg0: i32) -> (i32, i32) {
    %c0_i32 = arith.constant 0 : i32
    %c0_i32_0 = arith.constant 0 : i32
    %c0_i32_1 = arith.constant 0 : i32
    return %c0_i32, %c0_i32_0 : i32, i32
  }
  func.func @transform_7(%arg0: i32) -> (i32, i32) {
    %c0_i32 = arith.constant 0 : i32
    %c0_i32_0 = arith.constant 0 : i32
    %c0_i32_1 = arith.constant 0 : i32
    return %c0_i32, %c0_i32_0 : i32, i32
  }
  func.func @transform_8(%arg0: i32) -> (i32, i32) {
    %c0_i32 = arith.constant 0 : i32
    %c0_i32_0 = arith.constant 0 : i32
    %c0_i32_1 = arith.constant 0 : i32
    return %c0_i32, %c0_i32_0 : i32, i32
  }
  func.func @transform_9(%arg0: i32) -> (i32, i32) {
    %c0_i32 = arith.constant 0 : i32
    %c0_i32_0 = arith.constant 0 : i32
    return %arg0, %c0_i32 : i32, i32
  }
}

</mosaic_0001>

<bundles_post_ra>
// kernel: tpu_custom_call.1
= control target key start
LH: loop header
LB: loop body
LE: loop exit
PB: predicated region body
PF: predicated region fallthrough
CT: control target
= control target key end

     0   :  { %14 = vsyncpa [#allocation3], 0  ;;  %s1753_s0 = inlined_call_operand.vmem [shape: f32[256,16], index: 0, kind: input, shape index: {}]   ;;  %s1754_s1 = inlined_call_operand.vmem [shape: f32[256,1], index: 1, kind: input, shape index: {}]   ;;  %s1755_s2 = inlined_call_operand.vmem [shape: bf16[16,128], index: 2, kind: input, shape index: {}]   ;;  %s1756_s3 = inlined_call_operand.vmem [shape: bf16[1,128], index: 3, kind: input, shape index: {}]   ;;  %s1757_s4 = inlined_call_operand.vmem [shape: f32[1,128], index: 4, kind: input, shape index: {}]   ;;  %s1758_s5 = inlined_call_operand.vmem [shape: bf16[128,128], index: 5, kind: input, shape index: {}]   ;;  %s1759_s6 = inlined_call_operand.vmem [shape: f32[1,128], index: 6, kind: input, shape index: {}]   ;;  %s1760_s7 = inlined_call_operand.vmem [shape: bf16[128,128], index: 7, kind: input, shape index: {}]   ;;  %s1761_s8 = inlined_call_operand.vmem [shape: f32[1,128], index: 8, kind: input, shape index: {}]   ;;  %s1762_s9 = inlined_call_operand.hbm [shape: f32[256,128], index: 9, kind: output, shape index: {}]  }
   0x1   :  { %16 = vsyncpa [#allocation3 + $0x1], 0  ;;  %s1483_s30 = smov 0   ;;  %s1485_s10 = smov 0  }
   0x2   :  { %s1487_s11 = smov 0   ;;  %s1489_s12 = smov 0  }
   0x3 LB: > { %s1504_s13 = sadd.s32 4294967295, %s1427_s12   ;;  %s1140_s14 = sadd.s32 4294967294, %s1427_s12   ;;  %s1427_s12 = sphi %s1489_s12, %s1768_s12   ;;  %s1423_s11 = sphi %s1487_s11, %s1767_s11   ;;  %s1419_s10 = sphi %s1485_s10, %s1766_s10   ;;  %s1415_s30 = sphi %s1483_s30, %s1765_s30  }
   0x4   : > { %s1508_s15 = sadd.s32 1, %s1427_s12   ;;  %s228_s16 = sadd.s32 1, %s1423_s11 }
   0x5   : > { %s225_s17 = ssub.s32 %s1427_s12, %s1508_s15  ;;  %p238_p0 = scmp.ne.s32.totalorder %s1423_s11, %s1419_s10 }
   0x6   : > { %p226_p1 = scmp.eq.s32.totalorder %s225_s17, 0  ;;  %p239_p2 = scmp.eq.s32.totalorder %s1504_s13, 1 }
   0x7   : > { %p244_p3 = scmp.ne.s32.totalorder %s1419_s10, %s1415_s30  ;;  %p245_p4 = scmp.eq.s32.totalorder %s1140_s14, 1 }
   0x8   : > { %s1519_s18 = scalar_select %p226_p1, %s1423_s11, %s228_s16  }
   0x9   : > { %p1521_p5 = por %p239_p2, %p238_p0  ;;  %p1525_p6 = por %p245_p4, %p244_p3 }
   0xa   : > { %p1143_p7 = scmp.ge.s32.totalorder %s1427_s12, 1  ;;  %p302_p8 = scmp.lt.s32.totalorder %s1427_s12, 3 }
   0xc   : > { %p303_p9 = pnand %p1143_p7, %p302_p8 }
   0xd   : > { %s1145_s23 = sshll.u32 (!%p303_p9), %s1504_s13, 4  ;;  %s340_s22 = sand.u32 (!%p303_p9), 1, %s1419_s10  }
   0xe   : > { %306 = sbr.rel (%p303_p9) target bundleno = 679 (0x2a7), region = 56  ;;  %p344_p10 = scmp.lt.s32.totalorder (!%p303_p9), %s1145_s23, 31 }
   0xf   : > { %s1182_s26 = sshll.u32 (!%p303_p9), %s1504_s13, 11  ;;  %s1713_s13 = scalar_lea.sflag (!%p303_p9), [#allocation3], %s340_s22 }
  0x10   : > { %s1705_s16 = scalar_lea.hbm (!%p303_p9), %s1762_s9, %s1182_s26  ;;  %s1430_s21 = smov (!%p303_p9), [#allocation2]  }
  0x13   : > { %v1350_v0 = vld [vmem:[%s1755_s2] sm:$0xff]   ;;  %v1429_v1 = vmov 0   ;;  %s1770_s23 = smov (!%p344_p10, %s1145_s23), 31  ;;  %vm507_vm0 = vcmask 130048   ;;  %v1351_v23 = vld [vmem:[%s1758_s5 + $0x38] sm:$0xff]   ;;  %v1352_v30 = vld [vmem:[%s1758_s5 + $0x30] sm:$0xff]   ;;  %v481_v57 = vlaneseq }
  0x14   : > { %1224 = vmatprep.subr.bf16.mxu0 %v1350_v0  ;;  %1348 = vset.pattern.permute.xlu0 %v1429_v1  ;;  %s1146_s24 = sshll.u32 %s1770_s23, 3  ;;  %v1353_v33 = vld [vmem:[%s1758_s5 + $0x28] sm:$0xff]   ;;  %v1354_v38 = vld [vmem:[%s1758_s5 + $0x20] sm:$0xff]   ;;  %v1355_v42 = vld [vmem:[%s1758_s5 + $0x18] sm:$0xff]   ;;  %s1144_s23 = sshll.u32 %s340_s22, 7 }
  0x15   : > { %1225 = vmatpush3.bf16.msra.mxu0 %v1350_v0  ;;  %1349 = vset.pattern.permute.xlu1 %v1429_v1  ;;  %s1538_s27 = scalar_lea.vmem %s1753_s0, %s1146_s24  ;;  %s1549_s14 = scalar_lea.vmem %s1754_s1, %s1146_s24  ;;  %v1356_v47 = vld [vmem:[%s1758_s5 + $0x10] sm:$0xff]   ;;  %v1357_v48 = vld [vmem:[%s1758_s5 + $0x8] sm:$0xff]   ;;  %v1358_v49 = vld [vmem:[%s1758_s5] sm:$0xff]   ;;  %v482_v59 = vshrl.u32 %v481_v57, 7 }
  0x16   : > { %v357_v2 = vld [vmem:[%s1538_s27] sm:$0xff]  ;;  %v358_v3 = vld [vmem:[%s1538_s27 + $0x8] sm:$0xff]  ;;  %v359_v4 = vld [vmem:[%s1538_s27 + $0x10] sm:$0xff]  ;;  %1242 = vmatprep.subr.bf16.mxu1 %v1351_v23  ;;  %s1684_s25 = scalar_lea.vmem [#allocation2], %s1144_s23  ;;  %s1371_s23 = sshll.u32 %s1430_s21, 4  ;;  %s1372_s23 = int_to_ptr.vmem [resolvable:$false] %s1371_s23 }
  0x17   : > { %v373_v5 = vpack.c.bf16 %v358_v3, %v357_v2  ;;  %v360_v6 = vld [vmem:[%s1538_s27 + $0x18] sm:$0xff]  ;;  %v361_v7 = vld [vmem:[%s1538_s27 + $0x20] sm:$0xff]  ;;  %v362_v8 = vld [vmem:[%s1538_s27 + $0x28] sm:$0xff]  ;;  %1243 = vmatpush3.bf16.msra.mxu1 %v1351_v23  ;;  %v483_v63 = vsub.s32 0, %v482_v59  ;;  %s1066_s28 = sshll.u32 %s1684_s25, 4  ;;  %s1707_s28 = int_to_ptr.vmem [resolvable:$true] %s1066_s28 }
  0x18   : > { %v374_v9 = vpack.c.bf16 %v360_v6, %v359_v4  ;;  %v375_v10 = vpack.c.bf16 %v362_v8, %v361_v7  ;;  %v363_v11 = vld [vmem:[%s1538_s27 + $0x30] sm:$0xff]  ;;  %v364_v12 = vld [vmem:[%s1538_s27 + $0x38] sm:$0xff]  ;;  %v383_v13 = vld [vmem:[%s1549_s14] sm:$0xff]  ;;  %1244 = vmatprep.subr.bf16.mxu1 %v1352_v30  ;;  %s1367_s17 = scalar_lea.vmem %s1707_s28, 2048  ;;  %p1374_p0 = scmp.lt.s32.totalorder %s1707_s28, %s1372_s23 }
  0x19   : > { %1226 = vmatprep.mubr.msk.bf16.mxu0 %vm507_vm0, %v373_v5  ;;  %v385_v14 = vld [vmem:[%s1549_s14 + $0x10] sm:$0xff]  ;;  %v365_v15 = vld [vmem:[%s1538_s27 + $0x40] sm:$0xff]  ;;  %v366_v16 = vld [vmem:[%s1538_s27 + $0x48] sm:$0xff]  ;;  %403 = vperm.xlu0 %1348, %v383_v13   ;;  %v376_v19 = vpack.c.bf16 %v364_v12, %v363_v11  ;;  %p1368_p11 = scmp.ne.s32.totalorder %s1707_s28, %s1367_s17 }
  0x1a   : > { %1227 = vmatmul.mubr.msk.bf16.vlgmr.msra.gmra.mxu0 %vm507_vm0, %v374_v9  ;;  %413 = vperm.xlu1 %1349, %v385_v14   ;;  %v384_v17 = vld [vmem:[%s1549_s14 + $0x8] sm:$0xff]  ;;  %v386_v18 = vld [vmem:[%s1549_s14 + $0x18] sm:$0xff]  ;;  %v377_v20 = vpack.c.bf16 %v366_v16, %v365_v15  ;;  %v387_v21 = vld [vmem:[%s1549_s14 + $0x20] sm:$0xff] }
  0x1b   : > { %1230 = vmatprep.mubr.msk.bf16.mxu0 %vm507_vm0, %v375_v10  ;;  %v388_v22 = vld [vmem:[%s1549_s14 + $0x28] sm:$0xff]  ;;  %v367_v24 = vld [vmem:[%s1538_s27 + $0x50] sm:$0xff]  ;;  %v368_v25 = vld [vmem:[%s1538_s27 + $0x58] sm:$0xff]  ;;  %1245 = vmatpush3.bf16.msra.mxu1 %v1352_v30  ;;  %p1369_p12 = pnand %p1368_p11, %p1521_p5 }
  0x1c   : > { %v369_v26 = vld [vmem:[%s1538_s27 + $0x60] sm:$0xff]  ;;  %v370_v27 = vld [vmem:[%s1538_s27 + $0x68] sm:$0xff]  ;;  %v389_v28 = vld [vmem:[%s1549_s14 + $0x30] sm:$0xff]  ;;  %v378_v31 = vpack.c.bf16 %v368_v25, %v367_v24  ;;  %1246 = vmatprep.subr.bf16.mxu1 %v1353_v33 }
  0x1d   : > { %408 = vperm.xlu0 %1348, %v384_v17   ;;  %v390_v29 = vld [vmem:[%s1549_s14 + $0x38] sm:$0xff]  ;;  %v379_v32 = vpack.c.bf16 %v370_v27, %v369_v26  ;;  %v391_v34 = vld [vmem:[%s1549_s14 + $0x40] sm:$0xff]  ;;  %v392_v35 = vld [vmem:[%s1549_s14 + $0x48] sm:$0xff]  ;;  %p1370_p13 = pneg %p1369_p12 }
  0x1e   : > { %418 = vperm.xlu1 %1349, %v386_v18   ;;  %v371_v36 = vld [vmem:[%s1538_s27 + $0x70] sm:$0xff]  ;;  %v372_v37 = vld [vmem:[%s1538_s27 + $0x78] sm:$0xff]  ;;  %v395_v43 = vld [vmem:[%s1549_s14 + $0x60] sm:$0xff] }
  0x1f   : > { %1247 = vmatpush3.bf16.msra.mxu1 %v1353_v33  ;;  %v393_v39 = vld [vmem:[%s1549_s14 + $0x50] sm:$0xff]  ;;  %v394_v40 = vld [vmem:[%s1549_s14 + $0x58] sm:$0xff]  ;;  %v380_v41 = vpack.c.bf16 %v372_v37, %v371_v36  ;;  %v396_v44 = vld [vmem:[%s1549_s14 + $0x68] sm:$0xff] }
  0x20   : > { %1248 = vmatprep.subr.bf16.mxu1 %v1354_v38  ;;  %v397_v45 = vld [vmem:[%s1549_s14 + $0x70] sm:$0xff]  ;;  %v398_v46 = vld [vmem:[%s1549_s14 + $0x78] sm:$0xff]  ;;  %v1361_v52 = vld [vmem:[%s1760_s7 + $0x28] sm:$0xff]   ;;  %s1373_s14 = scalar_lea.vmem %s1372_s23, 4096 }
  0x21   : > { %423 = vperm.xlu0 %1348, %v387_v21   ;;  %v1359_v50 = vld [vmem:[%s1760_s7 + $0x38] sm:$0xff]   ;;  %v1360_v51 = vld [vmem:[%s1760_s7 + $0x30] sm:$0xff]   ;;  %v1362_v53 = vld [vmem:[%s1760_s7 + $0x20] sm:$0xff]   ;;  %p1375_p1 = scmp.lt.s32.totalorder %s1373_s14, %s1367_s17 }
  0x22   : > { %1231 = vmatmul.mubr.msk.bf16.gmra.mxu0 %vm507_vm0, %v376_v19  ;;  %428 = vperm.xlu1 %1349, %v388_v22   ;;  %v1363_v54 = vld [vmem:[%s1760_s7 + $0x18] sm:$0xff]   ;;  %v399_v61 = vld [vmem:[%s1756_s3] sm:$0x1] }
  0x23   : > { %1234 = vmatprep.mubr.msk.bf16.mxu0 %vm507_vm0, %v377_v20  ;;  %1249 = vmatpush3.bf16.msra.mxu1 %v1354_v38  ;;  %v400_v62 = vunpack.c.l.bf16 %v399_v61  ;;  %v1636_v15 = vld [vmem:[%s1757_s4] ss:$0 sm:$0xff]  ;;  %p1376_p2 = por %p1375_p1, %p1374_p0 }
  0x24   : > { %1250 = vmatprep.subr.bf16.mxu1 %v1355_v42  ;;  %1274 = vmatprep.subr.bf16.mxu0 %v1359_v50 }
  0x25   : > { %433 = vperm.xlu0 %1348, %v389_v28   ;;  %1275 = vmatpush3.bf16.msra.mxu0 %v1359_v50  ;;  %v1627_v2 = vrot.slane %v400_v62, %v483_v63  ;;  %p1377_p3 = pnand %p1376_p2, %p1370_p13 }
  0x26   : > { %438 = vperm.xlu1 %1349, %v390_v29   ;;  %1276 = vmatprep.subr.bf16.mxu0 %v1360_v51 }
  0x27   : > { %1251 = vmatpush3.bf16.msra.mxu1 %v1355_v42 }
  0x28   : > { %1252 = vmatprep.subr.bf16.mxu1 %v1356_v47 }
  0x29   : > { %443 = vperm.xlu0 %1348, %v391_v34   ;;  %1277 = vmatpush3.bf16.msra.mxu0 %v1360_v51 }
  0x2a   : > { %1235 = vmatmul.mubr.msk.bf16.gmra.mxu0 %vm507_vm0, %v378_v31  ;;  %448 = vperm.xlu1 %1349, %v392_v35  }
  0x2b   : > { %1238 = vmatprep.mubr.msk.bf16.mxu0 %vm507_vm0, %v379_v32  ;;  %1253 = vmatpush3.bf16.msra.mxu1 %v1356_v47 }
  0x2c   : > { %1254 = vmatprep.subr.bf16.mxu1 %v1357_v48  ;;  %1278 = vmatprep.subr.bf16.mxu0 %v1361_v52 }
  0x2d   : > { %453 = vperm.xlu0 %1348, %v393_v39   ;;  %1279 = vmatpush3.bf16.msra.mxu0 %v1361_v52 }
  0x2e   : > { %458 = vperm.xlu1 %1349, %v394_v40   ;;  %1280 = vmatprep.subr.bf16.mxu0 %v1362_v53 }
  0x2f   : > { %1255 = vmatpush3.bf16.msra.mxu1 %v1357_v48 }
  0x30   : > { %1256 = vmatprep.subr.bf16.mxu1 %v1358_v49 }
  0x31   : > { %463 = vperm.xlu0 %1348, %v395_v43   ;;  %1281 = vmatpush3.bf16.msra.mxu0 %v1362_v53 }
  0x32   : > { %1239 = vmatmul.mubr.msk.bf16.gmra.mxu0 %vm507_vm0, %v380_v41  ;;  %468 = vperm.xlu1 %1349, %v396_v44  }
  0x33   : > { %1257 = vmatpush3.bf16.msra.mxu1 %v1358_v49  ;;  %1282 = vmatprep.subr.bf16.mxu0 %v1363_v54 }
  0x35   : > { %473 = vperm.xlu0 %1348, %v397_v45   ;;  %1283 = vmatpush3.bf16.msra.mxu0 %v1363_v54 }
  0x36   : > { %478 = vperm.xlu1 %1349, %v398_v46  }
  0x94   : > { %v404_v55 = vpop.permute.xlu0 %403 }
  0x95   : > { %v414_v56 = vpop.permute.xlu1 %413  ;;  %v485_v3 = vmul.f32 %v1627_v2, %v404_v55 }
  0x96   : > { %v487_v5 = vmul.f32 %v1627_v2, %v414_v56 }
  0x98   : > { %v409_v58 = vpop.permute.xlu0 %408 }
  0x99   : > { %v419_v60 = vpop.permute.xlu1 %418  ;;  %v486_v13 = vmul.f32 %v1627_v2, %v409_v58 }
  0x9a   : > { %v488_v8 = vmul.f32 %v1627_v2, %v419_v60 }
  0x9c   : > { %v424_v0 = vpop.permute.xlu0 %423 }
  0x9d   : > { %v429_v1 = vpop.permute.xlu1 %428  ;;  %v489_v24 = vmul.f32 %v1627_v2, %v424_v0 }
  0x9e   : > { %v490_v38 = vmul.f32 %v1627_v2, %v429_v1 }
  0xa0   : > { %v434_v4 = vpop.permute.xlu0 %433 }
  0xa1   : > { %v439_v6 = vpop.permute.xlu1 %438  ;;  %v491_v26 = vmul.f32 %v1627_v2, %v434_v4 }
  0xa2   : > { %v492_v29 = vmul.f32 %v1627_v2, %v439_v6 }
  0xa4   : > { %v444_v14 = vpop.permute.xlu0 %443 }
  0xa5   : > { %v449_v17 = vpop.permute.xlu1 %448  ;;  %v493_v48 = vmul.f32 %v1627_v2, %v444_v14 }
  0xa6   : > { %v494_v62 = vmul.f32 %v1627_v2, %v449_v17 }
  0xa8   : > { %v454_v30 = vpop.permute.xlu0 %453 }
  0xa9   : > { %v459_v34 = vpop.permute.xlu1 %458  ;;  %v495_v51 = vmul.f32 %v1627_v2, %v454_v30 }
  0xaa   : > { %v496_v55 = vmul.f32 %v1627_v2, %v459_v34 }
  0xac   : > { %v464_v49 = vpop.permute.xlu0 %463 }
  0xad   : > { %v469_v52 = vpop.permute.xlu1 %468 }
  0xb0   : > { %v474_v4 = vpop.permute.xlu0 %473 }
  0xda   : > { %v1228_v7 = vpop.f32.mrf.mxu0 }
  0xdb   : > { %v575_v11 = vadd.f32 %v1228_v7, %v487_v5 }
  0xdc   : > { %v566_v9 = vpop.f32.mrf.mxu0 }
  0xdd   : > { %v567_v10 = vadd.f32 %v566_v9, %v485_v3  ;;  %v638_v22 = vadd.f32 %v1636_v15, %v575_v11  ;;  %v497_v11 = vmul.f32 %v1627_v2, %v464_v49 }
  0xde   : > { %v1229_v12 = vpop.f32.mrf.mxu0 }
  0xdf   : > { %v578_v16 = vadd.f32 %v1229_v12, %v488_v8  ;;  %v636_v21 = vadd.f32 %v1636_v15, %v567_v10  ;;  %v654_v35 = vmax.f32 %v638_v22, 0.0  ;;  %v479_v8 = vpop.permute.xlu1 %478 }
  0xe0   : > { %v569_v18 = vpop.f32.mrf.mxu0  ;;  %v500_v17 = vmul.f32 %v1627_v2, %v479_v8 }
  0xe1   : > { %v639_v19 = vadd.f32 %v1636_v15, %v578_v16  ;;  %v570_v20 = vadd.f32 %v569_v18, %v486_v13  ;;  %v652_v32 = vmax.f32 %v636_v21, 0.0  ;;  %v499_v13 = vmul.f32 %v1627_v2, %v474_v4 }
  0xe2   : > { %v1232_v23 = vpop.f32.mrf.mxu0 }
  0xe3   : > { %v637_v25 = vadd.f32 %v1636_v15, %v570_v20  ;;  %v655_v27 = vmax.f32 %v639_v19, 0.0  ;;  %v591_v36 = vadd.f32 %v1232_v23, %v491_v26 }
  0xe4   : > { %v582_v28 = vpop.f32.mrf.mxu0 }
  0xe5   : > { %v583_v31 = vadd.f32 %v582_v28, %v489_v24  ;;  %v653_v33 = vmax.f32 %v637_v25, 0.0  ;;  %v669_v42 = vpack.c.bf16 %v655_v27, %v654_v35  ;;  %v642_v46 = vadd.f32 %v1636_v15, %v591_v36 }
  0xe6   : > { %v1233_v37 = vpop.f32.mrf.mxu0  ;;  %v498_v24 = vmul.f32 %v1627_v2, %v469_v52 }
  0xe7   : > { %v594_v39 = vadd.f32 %v1233_v37, %v492_v29  ;;  %v668_v40 = vpack.c.bf16 %v653_v33, %v652_v32  ;;  %v640_v43 = vadd.f32 %v1636_v15, %v583_v31  ;;  %v658_v59 = vmax.f32 %v642_v46, 0.0 }
  0xe8   : > { %v585_v41 = vpop.f32.mrf.mxu0 }
  0xe9   : > { %v643_v44 = vadd.f32 %v1636_v15, %v594_v39  ;;  %v586_v45 = vadd.f32 %v585_v41, %v490_v38  ;;  %1258 = vmatprep.mubr.bf16.mxu1 %v668_v40  ;;  %v656_v56 = vmax.f32 %v640_v43, 0.0  ;;  %v1364_v39 = vld [vmem:[%s1760_s7 + $0x10] sm:$0xff]   ;;  %v1365_v40 = vld [vmem:[%s1760_s7 + $0x8] sm:$0xff]   ;;  %v1159_v43 = vld [vmem:[%s1759_s6] ss:$0 sm:$0xff] }
  0xea   : > { %v1236_v47 = vpop.f32.mrf.mxu0  ;;  %1259 = vmatmul.mubr.bf16.vlgmr.msra.gmra.mxu1 %v669_v42  ;;  %1284 = vmatprep.subr.bf16.mxu0 %v1364_v39 }
  0xeb   : > { %v641_v50 = vadd.f32 %v1636_v15, %v586_v45  ;;  %v659_v53 = vmax.f32 %v643_v44, 0.0  ;;  %v607_v60 = vadd.f32 %v1236_v47, %v495_v51  ;;  %1285 = vmatpush3.bf16.msra.mxu0 %v1364_v39 }
  0xec   : > { %v598_v54 = vpop.f32.mrf.mxu0  ;;  %1286 = vmatprep.subr.bf16.mxu0 %v1365_v40 }
  0xed   : > { %v657_v57 = vmax.f32 %v641_v50, 0.0  ;;  %v599_v58 = vadd.f32 %v598_v54, %v493_v48  ;;  %v671_v3 = vpack.c.bf16 %v659_v53, %v658_v59  ;;  %v646_v9 = vadd.f32 %v1636_v15, %v607_v60 }
  0xee   : > { %v1237_v61 = vpop.f32.mrf.mxu0 }
  0xef   : > { %v610_v63 = vadd.f32 %v1237_v61, %v496_v55  ;;  %v670_v0 = vpack.c.bf16 %v657_v57, %v656_v56  ;;  %v644_v5 = vadd.f32 %v1636_v15, %v599_v58  ;;  %v662_v21 = vmax.f32 %v646_v9, 0.0  ;;  %1287 = vmatpush3.bf16.msra.mxu0 %v1365_v40 }
  0xf0   : > { %v601_v1 = vpop.f32.mrf.mxu0 }
  0xf1   : > { %v647_v6 = vadd.f32 %v1636_v15, %v610_v63  ;;  %v602_v7 = vadd.f32 %v601_v1, %v494_v62  ;;  %1262 = vmatprep.mubr.bf16.mxu1 %v670_v0  ;;  %v660_v18 = vmax.f32 %v644_v5, 0.0 }
  0xf2   : > { %v1240_v10 = vpop.f32.mrf.mxu0  ;;  %1263 = vmatmul.mubr.bf16.gmra.mxu1 %v671_v3 }
  0xf3   : > { %v645_v12 = vadd.f32 %v1636_v15, %v602_v7  ;;  %v663_v14 = vmax.f32 %v647_v6, 0.0  ;;  %v623_v22 = vadd.f32 %v1240_v10, %v499_v13 }
  0xf4   : > { %v614_v16 = vpop.f32.mrf.mxu0 }
  0xf5   : > { %v661_v19 = vmax.f32 %v645_v12, 0.0  ;;  %v615_v20 = vadd.f32 %v614_v16, %v497_v11  ;;  %v673_v28 = vpack.c.bf16 %v663_v14, %v662_v21  ;;  %v650_v32 = vadd.f32 %v1636_v15, %v623_v22 }
  0xf6   : > { %v1241_v23 = vpop.f32.mrf.mxu0 }
  0xf7   : > { %v626_v25 = vadd.f32 %v1241_v23, %v500_v17  ;;  %v672_v26 = vpack.c.bf16 %v661_v19, %v660_v18  ;;  %v648_v29 = vadd.f32 %v1636_v15, %v615_v20  ;;  %v666_v37 = vmax.f32 %v650_v32, 0.0 }
  0xf8   : > { %v617_v27 = vpop.f32.mrf.mxu0 }
  0xf9   : > { %v651_v30 = vadd.f32 %v1636_v15, %v626_v25  ;;  %v618_v31 = vadd.f32 %v617_v27, %v498_v24  ;;  %1266 = vmatprep.mubr.bf16.mxu1 %v672_v26  ;;  %v664_v35 = vmax.f32 %v648_v29, 0.0 }
  0xfa   : > { %1267 = vmatmul.mubr.bf16.gmra.mxu1 %v673_v28 }
  0xfb   : > { %v649_v33 = vadd.f32 %v1636_v15, %v618_v31  ;;  %v667_v34 = vmax.f32 %v651_v30, 0.0  ;;  %v1366_v15 = vld [vmem:[%s1760_s7] sm:$0xff]  }
  0xfc   : > { %1288 = vmatprep.subr.bf16.mxu0 %v1366_v15 }
  0xfd   : > { %v665_v36 = vmax.f32 %v649_v33, 0.0  ;;  %v675_v38 = vpack.c.bf16 %v667_v34, %v666_v37  ;;  %1289 = vmatpush3.bf16.msra.mxu0 %v1366_v15 }
  0xff   : > { %v674_v2 = vpack.c.bf16 %v665_v36, %v664_v35  ;;  %v1168_v36 = vld [vmem:[%s1761_s8] ss:$0 sm:$0xff] }
 0x101   : > { %1270 = vmatprep.mubr.bf16.mxu1 %v674_v2 }
 0x102   : > { %1271 = vmatmul.mubr.bf16.gmra.mxu1 %v675_v38 }
 0x1aa   : > { %v1260_v41 = vpop.f32.mrf.mxu1 }
 0x1ab   : > { %v790_v47 = vadd.f32 %v1260_v41, %v1159_v43 }
 0x1ac   : > { %v781_v42 = vpop.f32.mrf.mxu1 }
 0x1ad   : > { %v782_v45 = vadd.f32 %v1159_v43, %v781_v42  ;;  %v846_v54 = vmax.f32 %v790_v47, 0.0 }
 0x1ae   : > { %v1261_v44 = vpop.f32.mrf.mxu1 }
 0x1af   : > { %v793_v46 = vadd.f32 %v1261_v44, %v1159_v43  ;;  %v844_v52 = vmax.f32 %v782_v45, 0.0 }
 0x1b0   : > { %v784_v48 = vpop.f32.mrf.mxu1 }
 0x1b1   : > { %v785_v49 = vadd.f32 %v1159_v43, %v784_v48  ;;  %v847_v50 = vmax.f32 %v793_v46, 0.0 }
 0x1b2   : > { %v1264_v51 = vpop.f32.mrf.mxu1 }
 0x1b3   : > { %v845_v53 = vmax.f32 %v785_v49, 0.0  ;;  %v861_v57 = vpack.c.bf16 %v847_v50, %v846_v54  ;;  %v806_v61 = vadd.f32 %v1264_v51, %v1159_v43 }
 0x1b4   : > { %v797_v55 = vpop.f32.mrf.mxu1 }
 0x1b5   : > { %v860_v56 = vpack.c.bf16 %v845_v53, %v844_v52  ;;  %v798_v59 = vadd.f32 %v1159_v43, %v797_v55  ;;  %v850_v5 = vmax.f32 %v806_v61, 0.0 }
 0x1b6   : > { %v1265_v58 = vpop.f32.mrf.mxu1 }
 0x1b7   : > { %v809_v60 = vadd.f32 %v1265_v58, %v1159_v43  ;;  %1290 = vmatprep.mubr.bf16.mxu0 %v860_v56  ;;  %v848_v3 = vmax.f32 %v798_v59, 0.0 }
 0x1b8   : > { %v800_v62 = vpop.f32.mrf.mxu1  ;;  %1291 = vmatmul.mubr.bf16.vlgmr.msra.gmra.mxu0 %v861_v57 }
 0x1b9   : > { %v801_v63 = vadd.f32 %v1159_v43, %v800_v62  ;;  %v851_v0 = vmax.f32 %v809_v60, 0.0 }
 0x1ba   : > { %v1268_v1 = vpop.f32.mrf.mxu1 }
 0x1bb   : > { %v849_v4 = vmax.f32 %v801_v63, 0.0  ;;  %v863_v8 = vpack.c.bf16 %v851_v0, %v850_v5  ;;  %v822_v12 = vadd.f32 %v1268_v1, %v1159_v43 }
 0x1bc   : > { %v813_v6 = vpop.f32.mrf.mxu1 }
 0x1bd   : > { %v862_v7 = vpack.c.bf16 %v849_v4, %v848_v3  ;;  %v814_v10 = vadd.f32 %v1159_v43, %v813_v6  ;;  %v854_v20 = vmax.f32 %v822_v12, 0.0 }
 0x1be   : > { %v1269_v9 = vpop.f32.mrf.mxu1 }
 0x1bf   : > { %v825_v11 = vadd.f32 %v1269_v9, %v1159_v43  ;;  %1294 = vmatprep.mubr.bf16.mxu0 %v862_v7  ;;  %v852_v18 = vmax.f32 %v814_v10, 0.0 }
 0x1c0   : > { %v816_v13 = vpop.f32.mrf.mxu1  ;;  %1295 = vmatmul.mubr.bf16.gmra.mxu0 %v863_v8 }
 0x1c1   : > { %v817_v14 = vadd.f32 %v1159_v43, %v816_v13  ;;  %v855_v16 = vmax.f32 %v825_v11, 0.0 }
 0x1c2   : > { %v1272_v17 = vpop.f32.mrf.mxu1 }
 0x1c3   : > { %v853_v19 = vmax.f32 %v817_v14, 0.0  ;;  %v865_v23 = vpack.c.bf16 %v855_v16, %v854_v20  ;;  %v838_v27 = vadd.f32 %v1272_v17, %v1159_v43 }
 0x1c4   : > { %v829_v21 = vpop.f32.mrf.mxu1 }
 0x1c5   : > { %v864_v22 = vpack.c.bf16 %v853_v19, %v852_v18  ;;  %v830_v25 = vadd.f32 %v1159_v43, %v829_v21  ;;  %v858_v33 = vmax.f32 %v838_v27, 0.0 }
 0x1c6   : > { %v1273_v24 = vpop.f32.mrf.mxu1 }
 0x1c7   : > { %v841_v26 = vadd.f32 %v1273_v24, %v1159_v43  ;;  %1298 = vmatprep.mubr.bf16.mxu0 %v864_v22  ;;  %v856_v31 = vmax.f32 %v830_v25, 0.0 }
 0x1c8   : > { %v832_v28 = vpop.f32.mrf.mxu1  ;;  %1299 = vmatmul.mubr.bf16.gmra.mxu0 %v865_v23 }
 0x1c9   : > { %v833_v29 = vadd.f32 %v1159_v43, %v832_v28  ;;  %v859_v30 = vmax.f32 %v841_v26, 0.0 }
 0x1cb   : > { %v857_v32 = vmax.f32 %v833_v29, 0.0  ;;  %v867_v35 = vpack.c.bf16 %v859_v30, %v858_v33 }
 0x1cd   : > { %v866_v34 = vpack.c.bf16 %v857_v32, %v856_v31 }
 0x1cf   : > { %1302 = vmatprep.mubr.bf16.mxu0 %v866_v34 }
 0x1d0   : > { %1303 = vmatmul.mubr.bf16.gmra.mxu0 %v867_v35 }
 0x278   : > { %v1292_v37 = vpop.f32.mrf.mxu0 }
 0x279   : > { %v982_v2 = vadd.f32 %v1292_v37, %v1168_v36 }
 0x27a   : > { %v973_v38 = vpop.f32.mrf.mxu0 }
 0x27b   : > { %1038 = vst [vmem:[%s1684_s25 + $0x10] sm:$0xff] %v982_v2  ;;  %v974_v39 = vadd.f32 %v1168_v36, %v973_v38 }
 0x27c   : > { %v1293_v40 = vpop.f32.mrf.mxu0 }
 0x27d   : > { %1036 = vst [vmem:[%s1684_s25] sm:$0xff] %v974_v39  ;;  %v985_v15 = vadd.f32 %v1293_v40, %v1168_v36 }
 0x27e   : > { %v976_v41 = vpop.f32.mrf.mxu0 }
 0x27f   : > { %1039 = vst [vmem:[%s1684_s25 + $0x18] sm:$0xff] %v985_v15  ;;  %v977_v42 = vadd.f32 %v1168_v36, %v976_v41 }
 0x280   : > { %v1296_v43 = vpop.f32.mrf.mxu0 }
 0x281   : > { %1037 = vst [vmem:[%s1684_s25 + $0x8] sm:$0xff] %v977_v42  ;;  %v998_v44 = vadd.f32 %v1296_v43, %v1168_v36 }
 0x282   : > { %v989_v45 = vpop.f32.mrf.mxu0 }
 0x283   : > { %1042 = vst [vmem:[%s1684_s25 + $0x30] sm:$0xff] %v998_v44  ;;  %v990_v46 = vadd.f32 %v1168_v36, %v989_v45 }
 0x284   : > { %v1297_v47 = vpop.f32.mrf.mxu0 }
 0x285   : > { %1040 = vst [vmem:[%s1684_s25 + $0x20] sm:$0xff] %v990_v46  ;;  %v1001_v48 = vadd.f32 %v1297_v47, %v1168_v36 }
 0x286   : > { %v992_v49 = vpop.f32.mrf.mxu0 }
 0x287   : > { %1043 = vst [vmem:[%s1684_s25 + $0x38] sm:$0xff] %v1001_v48  ;;  %v993_v50 = vadd.f32 %v1168_v36, %v992_v49 }
 0x288   : > { %v1300_v51 = vpop.f32.mrf.mxu0 }
 0x289   : > { %1041 = vst [vmem:[%s1684_s25 + $0x28] sm:$0xff] %v993_v50  ;;  %v1014_v52 = vadd.f32 %v1300_v51, %v1168_v36 }
 0x28a   : > { %v1005_v53 = vpop.f32.mrf.mxu0 }
 0x28b   : > { %1046 = vst [vmem:[%s1684_s25 + $0x50] sm:$0xff] %v1014_v52  ;;  %v1006_v54 = vadd.f32 %v1168_v36, %v1005_v53 }
 0x28c   : > { %v1301_v55 = vpop.f32.mrf.mxu0 }
 0x28d   : > { %1044 = vst [vmem:[%s1684_s25 + $0x40] sm:$0xff] %v1006_v54  ;;  %v1017_v56 = vadd.f32 %v1301_v55, %v1168_v36 }
 0x28e   : > { %v1008_v57 = vpop.f32.mrf.mxu0 }
 0x28f   : > { %1047 = vst [vmem:[%s1684_s25 + $0x58] sm:$0xff] %v1017_v56  ;;  %v1009_v58 = vadd.f32 %v1168_v36, %v1008_v57 }
 0x290   : > { %v1304_v59 = vpop.f32.mrf.mxu0 }
 0x291   : > { %1045 = vst [vmem:[%s1684_s25 + $0x48] sm:$0xff] %v1009_v58  ;;  %v1030_v60 = vadd.f32 %v1304_v59, %v1168_v36 }
 0x292   : > { %v1021_v61 = vpop.f32.mrf.mxu0 }
 0x293   : > { %1050 = vst [vmem:[%s1684_s25 + $0x70] sm:$0xff] %v1030_v60  ;;  %v1022_v62 = vadd.f32 %v1168_v36, %v1021_v61 }
 0x294   : > { %v1305_v63 = vpop.f32.mrf.mxu0 }
 0x295   : > { %1048 = vst [vmem:[%s1684_s25 + $0x60] sm:$0xff] %v1022_v62  ;;  %v1033_v0 = vadd.f32 %v1305_v63, %v1168_v36 }
 0x296   : > { %v1024_v1 = vpop.f32.mrf.mxu0 }
 0x297   : > { %1051 = vst [vmem:[%s1684_s25 + $0x78] sm:$0xff] %v1033_v0  ;;  %v1025_v3 = vadd.f32 %v1168_v36, %v1024_v1 }
 0x299   : > { %1049 = vst [vmem:[%s1684_s25 + $0x68] sm:$0xff] %v1025_v3 }
 0x29a   : > { %1380 = shalt.err (!%p1377_p3)
}
 0x29b   : > { %s1381_s22 = scalar_lea.hbm %s1705_s16, 2048  ;;  %s1385_s26 = scalar_lea.hbm %s1762_s9, 4096 }
 0x29c   : > { %p1382_p4 = scmp.ne.s32.totalorder %s1705_s16, %s1381_s22  ;;  %p1386_p9 = scmp.lt.s32.totalorder %s1705_s16, %s1762_s9 }
 0x29d   : > { %p1387_p10 = scmp.lt.s32.totalorder %s1385_s26, %s1381_s22 }
 0x29e   : > { %p1383_p7 = pnand %p1382_p4, %p1521_p5 }
 0x29f   : > { %p1388_p11 = por %p1387_p10, %p1386_p9 }
 0x2a0   : > { %p1384_p8 = pneg %p1383_p7 }
 0x2a2   : > { %p1389_p12 = pnand %p1388_p11, %p1384_p8 }
 0x2a4   : > { %1392 = shalt.err (!%p1389_p12)
}
 0x2a5   : > { %s1431_s17 = smov 128   ;;  %s1432_s21 = smov 8  }
 0x2a6   : > { %1306 = dma.vmem_to_hbm [thread:$0]  (%p1521_p5), %s1707_s28, 2048, %s1705_s16, %s1713_s13, %s1431_s17, %s1431_s17, %s1432_s21  }
 0x2a7 PF: > { %p1312_p13 = scmp.ge.s32.totalorder %s1427_s12, 2  ;;  %s1081_s23 = sand.u32 1, %s1415_s30  }
 0x2a8   : > { %s1082_s14 = scalar_lea.sflag [#allocation3], %s1081_s23 }
 0x2a9   : > { %p1309_p0 = pnand %p1312_p13, %p1525_p6 }
 0x2ab   : > { %p1310_p1 = pneg %p1309_p0 }
 0x2ad   : > { %1410 = dma.done.wait (%p1310_p1), %s1082_s14, 2048  }
 0x2ae   : > { %1412 = vsyncadd (%p1310_p1), %s1082_s14, 4294965248  ;;  %p19_p2 = scmp.ge.s32.totalorder %s1508_s15, 4   ;;  %s1765_s30 = smov %s1419_s10 }
 0x2af   : > { %s1766_s10 = smov %s1423_s11  ;;  %s1767_s11 = smov %s1519_s18 }
 0x2b0   : > { %s1768_s12 = smov %s1508_s15  ;;  %21 = sbr.rel (!%p19_p2) target bundleno = 3 (0x3), region = 94 }
 0x2b5   :  { %1087 = vsyncpa [#allocation3], 1 }
 0x2b6   :  { %1089 = vsyncpa [#allocation3 + $0x1], 1 }

// kernel: tpu_custom_call.1
= control target key start
LH: loop header
LB: loop body
LE: loop exit
PB: predicated region body
PF: predicated region fallthrough
CT: control target
= control target key end

     0   :  { %14 = vsyncpa [#allocation3], 0  ;;  %s1753_s0 = inlined_call_operand.vmem [shape: f32[256,16], index: 0, kind: input, shape index: {}]   ;;  %s1754_s1 = inlined_call_operand.vmem [shape: f32[256,1], index: 1, kind: input, shape index: {}]   ;;  %s1755_s2 = inlined_call_operand.vmem [shape: bf16[16,128], index: 2, kind: input, shape index: {}]   ;;  %s1756_s3 = inlined_call_operand.vmem [shape: bf16[1,128], index: 3, kind: input, shape index: {}]   ;;  %s1757_s4 = inlined_call_operand.vmem [shape: f32[1,128], index: 4, kind: input, shape index: {}]   ;;  %s1758_s5 = inlined_call_operand.vmem [shape: bf16[128,128], index: 5, kind: input, shape index: {}]   ;;  %s1759_s6 = inlined_call_operand.vmem [shape: f32[1,128], index: 6, kind: input, shape index: {}]   ;;  %s1760_s7 = inlined_call_operand.vmem [shape: bf16[128,128], index: 7, kind: input, shape index: {}]   ;;  %s1761_s8 = inlined_call_operand.vmem [shape: f32[1,128], index: 8, kind: input, shape index: {}]   ;;  %s1762_s9 = inlined_call_operand.hbm [shape: f32[256,128], index: 9, kind: output, shape index: {}]  }
   0x1   :  { %16 = vsyncpa [#allocation3 + $0x1], 0  ;;  %s1483_s30 = smov 0   ;;  %s1485_s10 = smov 0  }
   0x2   :  { %s1487_s11 = smov 0   ;;  %s1489_s12 = smov 0  }
   0x3 LB: > { %s1504_s13 = sadd.s32 4294967295, %s1427_s12   ;;  %s1140_s14 = sadd.s32 4294967294, %s1427_s12   ;;  %s1427_s12 = sphi %s1489_s12, %s1768_s12   ;;  %s1423_s11 = sphi %s1487_s11, %s1767_s11   ;;  %s1419_s10 = sphi %s1485_s10, %s1766_s10   ;;  %s1415_s30 = sphi %s1483_s30, %s1765_s30  }
   0x4   : > { %s1508_s15 = sadd.s32 1, %s1427_s12   ;;  %s228_s16 = sadd.s32 1, %s1423_s11 }
   0x5   : > { %s225_s17 = ssub.s32 %s1427_s12, %s1508_s15  ;;  %p238_p0 = scmp.ne.s32.totalorder %s1423_s11, %s1419_s10 }
   0x6   : > { %p226_p1 = scmp.eq.s32.totalorder %s225_s17, 0  ;;  %p239_p2 = scmp.eq.s32.totalorder %s1504_s13, 1 }
   0x7   : > { %p244_p3 = scmp.ne.s32.totalorder %s1419_s10, %s1415_s30  ;;  %p245_p4 = scmp.eq.s32.totalorder %s1140_s14, 1 }
   0x8   : > { %s1519_s18 = scalar_select %p226_p1, %s1423_s11, %s228_s16  }
   0x9   : > { %p1521_p5 = por %p239_p2, %p238_p0  ;;  %p1525_p6 = por %p245_p4, %p244_p3 }
   0xa   : > { %p1143_p7 = scmp.ge.s32.totalorder %s1427_s12, 1  ;;  %p302_p8 = scmp.lt.s32.totalorder %s1427_s12, 3 }
   0xc   : > { %p303_p9 = pnand %p1143_p7, %p302_p8 }
   0xd   : > { %s1145_s23 = sshll.u32 (!%p303_p9), %s1504_s13, 4  ;;  %s340_s22 = sand.u32 (!%p303_p9), 1, %s1419_s10  }
   0xe   : > { %306 = sbr.rel (%p303_p9) target bundleno = 679 (0x2a7), region = 56  ;;  %p344_p10 = scmp.lt.s32.totalorder (!%p303_p9), %s1145_s23, 31 }
   0xf   : > { %s1182_s26 = sshll.u32 (!%p303_p9), %s1504_s13, 11  ;;  %s1713_s13 = scalar_lea.sflag (!%p303_p9), [#allocation3], %s340_s22 }
  0x10   : > { %s1705_s16 = scalar_lea.hbm (!%p303_p9), %s1762_s9, %s1182_s26  ;;  %s1430_s21 = smov (!%p303_p9), [#allocation2]  }
  0x13   : > { %v1350_v0 = vld [vmem:[%s1755_s2] sm:$0xff]   ;;  %v1429_v1 = vmov 0   ;;  %s1770_s23 = smov (!%p344_p10, %s1145_s23), 31  ;;  %vm507_vm0 = vcmask 130048   ;;  %v1351_v23 = vld [vmem:[%s1758_s5 + $0x38] sm:$0xff]   ;;  %v1352_v30 = vld [vmem:[%s1758_s5 + $0x30] sm:$0xff]   ;;  %v481_v57 = vlaneseq }
  0x14   : > { %1224 = vmatprep.subr.bf16.mxu0 %v1350_v0  ;;  %1348 = vset.pattern.permute.xlu0 %v1429_v1  ;;  %s1146_s24 = sshll.u32 %s1770_s23, 3  ;;  %v1353_v33 = vld [vmem:[%s1758_s5 + $0x28] sm:$0xff]   ;;  %v1354_v38 = vld [vmem:[%s1758_s5 + $0x20] sm:$0xff]   ;;  %v1355_v42 = vld [vmem:[%s1758_s5 + $0x18] sm:$0xff]   ;;  %s1144_s23 = sshll.u32 %s340_s22, 7 }
  0x15   : > { %1225 = vmatpush3.bf16.msra.mxu0 %v1350_v0  ;;  %1349 = vset.pattern.permute.xlu1 %v1429_v1  ;;  %s1538_s27 = scalar_lea.vmem %s1753_s0, %s1146_s24  ;;  %s1549_s14 = scalar_lea.vmem %s1754_s1, %s1146_s24  ;;  %v1356_v47 = vld [vmem:[%s1758_s5 + $0x10] sm:$0xff]   ;;  %v1357_v48 = vld [vmem:[%s1758_s5 + $0x8] sm:$0xff]   ;;  %v1358_v49 = vld [vmem:[%s1758_s5] sm:$0xff]   ;;  %v482_v59 = vshrl.u32 %v481_v57, 7 }
  0x16   : > { %v357_v2 = vld [vmem:[%s1538_s27] sm:$0xff]  ;;  %v358_v3 = vld [vmem:[%s1538_s27 + $0x8] sm:$0xff]  ;;  %v359_v4 = vld [vmem:[%s1538_s27 + $0x10] sm:$0xff]  ;;  %1242 = vmatprep.subr.bf16.mxu1 %v1351_v23  ;;  %s1684_s25 = scalar_lea.vmem [#allocation2], %s1144_s23  ;;  %s1371_s23 = sshll.u32 %s1430_s21, 4  ;;  %s1372_s23 = int_to_ptr.vmem [resolvable:$false] %s1371_s23 }
  0x17   : > { %v373_v5 = vpack.c.bf16 %v358_v3, %v357_v2  ;;  %v360_v6 = vld [vmem:[%s1538_s27 + $0x18] sm:$0xff]  ;;  %v361_v7 = vld [vmem:[%s1538_s27 + $0x20] sm:$0xff]  ;;  %v362_v8 = vld [vmem:[%s1538_s27 + $0x28] sm:$0xff]  ;;  %1243 = vmatpush3.bf16.msra.mxu1 %v1351_v23  ;;  %v483_v63 = vsub.s32 0, %v482_v59  ;;  %s1066_s28 = sshll.u32 %s1684_s25, 4  ;;  %s1707_s28 = int_to_ptr.vmem [resolvable:$true] %s1066_s28 }
  0x18   : > { %v374_v9 = vpack.c.bf16 %v360_v6, %v359_v4  ;;  %v375_v10 = vpack.c.bf16 %v362_v8, %v361_v7  ;;  %v363_v11 = vld [vmem:[%s1538_s27 + $0x30] sm:$0xff]  ;;  %v364_v12 = vld [vmem:[%s1538_s27 + $0x38] sm:$0xff]  ;;  %v383_v13 = vld [vmem:[%s1549_s14] sm:$0xff]  ;;  %1244 = vmatprep.subr.bf16.mxu1 %v1352_v30  ;;  %s1367_s17 = scalar_lea.vmem %s1707_s28, 2048  ;;  %p1374_p0 = scmp.lt.s32.totalorder %s1707_s28, %s1372_s23 }
  0x19   : > { %1226 = vmatprep.mubr.msk.bf16.mxu0 %vm507_vm0, %v373_v5  ;;  %v385_v14 = vld [vmem:[%s1549_s14 + $0x10] sm:$0xff]  ;;  %v365_v15 = vld [vmem:[%s1538_s27 + $0x40] sm:$0xff]  ;;  %v366_v16 = vld [vmem:[%s1538_s27 + $0x48] sm:$0xff]  ;;  %403 = vperm.xlu0 %1348, %v383_v13   ;;  %v376_v19 = vpack.c.bf16 %v364_v12, %v363_v11  ;;  %p1368_p11 = scmp.ne.s32.totalorder %s1707_s28, %s1367_s17 }
  0x1a   : > { %1227 = vmatmul.mubr.msk.bf16.vlgmr.msra.gmra.mxu0 %vm507_vm0, %v374_v9  ;;  %413 = vperm.xlu1 %1349, %v385_v14   ;;  %v384_v17 = vld [vmem:[%s1549_s14 + $0x8] sm:$0xff]  ;;  %v386_v18 = vld [vmem:[%s1549_s14 + $0x18] sm:$0xff]  ;;  %v377_v20 = vpack.c.bf16 %v366_v16, %v365_v15  ;;  %v387_v21 = vld [vmem:[%s1549_s14 + $0x20] sm:$0xff] }
  0x1b   : > { %1230 = vmatprep.mubr.msk.bf16.mxu0 %vm507_vm0, %v375_v10  ;;  %v388_v22 = vld [vmem:[%s1549_s14 + $0x28] sm:$0xff]  ;;  %v367_v24 = vld [vmem:[%s1538_s27 + $0x50] sm:$0xff]  ;;  %v368_v25 = vld [vmem:[%s1538_s27 + $0x58] sm:$0xff]  ;;  %1245 = vmatpush3.bf16.msra.mxu1 %v1352_v30  ;;  %p1369_p12 = pnand %p1368_p11, %p1521_p5 }
  0x1c   : > { %v369_v26 = vld [vmem:[%s1538_s27 + $0x60] sm:$0xff]  ;;  %v370_v27 = vld [vmem:[%s1538_s27 + $0x68] sm:$0xff]  ;;  %v389_v28 = vld [vmem:[%s1549_s14 + $0x30] sm:$0xff]  ;;  %v378_v31 = vpack.c.bf16 %v368_v25, %v367_v24  ;;  %1246 = vmatprep.subr.bf16.mxu1 %v1353_v33 }
  0x1d   : > { %408 = vperm.xlu0 %1348, %v384_v17   ;;  %v390_v29 = vld [vmem:[%s1549_s14 + $0x38] sm:$0xff]  ;;  %v379_v32 = vpack.c.bf16 %v370_v27, %v369_v26  ;;  %v391_v34 = vld [vmem:[%s1549_s14 + $0x40] sm:$0xff]  ;;  %v392_v35 = vld [vmem:[%s1549_s14 + $0x48] sm:$0xff]  ;;  %p1370_p13 = pneg %p1369_p12 }
  0x1e   : > { %418 = vperm.xlu1 %1349, %v386_v18   ;;  %v371_v36 = vld [vmem:[%s1538_s27 + $0x70] sm:$0xff]  ;;  %v372_v37 = vld [vmem:[%s1538_s27 + $0x78] sm:$0xff]  ;;  %v395_v43 = vld [vmem:[%s1549_s14 + $0x60] sm:$0xff] }
  0x1f   : > { %1247 = vmatpush3.bf16.msra.mxu1 %v1353_v33  ;;  %v393_v39 = vld [vmem:[%s1549_s14 + $0x50] sm:$0xff]  ;;  %v394_v40 = vld [vmem:[%s1549_s14 + $0x58] sm:$0xff]  ;;  %v380_v41 = vpack.c.bf16 %v372_v37, %v371_v36  ;;  %v396_v44 = vld [vmem:[%s1549_s14 + $0x68] sm:$0xff] }
  0x20   : > { %1248 = vmatprep.subr.bf16.mxu1 %v1354_v38  ;;  %v397_v45 = vld [vmem:[%s1549_s14 + $0x70] sm:$0xff]  ;;  %v398_v46 = vld [vmem:[%s1549_s14 + $0x78] sm:$0xff]  ;;  %v1361_v52 = vld [vmem:[%s1760_s7 + $0x28] sm:$0xff]   ;;  %s1373_s14 = scalar_lea.vmem %s1372_s23, 4096 }
  0x21   : > { %423 = vperm.xlu0 %1348, %v387_v21   ;;  %v1359_v50 = vld [vmem:[%s1760_s7 + $0x38] sm:$0xff]   ;;  %v1360_v51 = vld [vmem:[%s1760_s7 + $0x30] sm:$0xff]   ;;  %v1362_v53 = vld [vmem:[%s1760_s7 + $0x20] sm:$0xff]   ;;  %p1375_p1 = scmp.lt.s32.totalorder %s1373_s14, %s1367_s17 }
  0x22   : > { %1231 = vmatmul.mubr.msk.bf16.gmra.mxu0 %vm507_vm0, %v376_v19  ;;  %428 = vperm.xlu1 %1349, %v388_v22   ;;  %v1363_v54 = vld [vmem:[%s1760_s7 + $0x18] sm:$0xff]   ;;  %v399_v61 = vld [vmem:[%s1756_s3] sm:$0x1] }
  0x23   : > { %1234 = vmatprep.mubr.msk.bf16.mxu0 %vm507_vm0, %v377_v20  ;;  %1249 = vmatpush3.bf16.msra.mxu1 %v1354_v38  ;;  %v400_v62 = vunpack.c.l.bf16 %v399_v61  ;;  %v1636_v15 = vld [vmem:[%s1757_s4] ss:$0 sm:$0xff]  ;;  %p1376_p2 = por %p1375_p1, %p1374_p0 }
  0x24   : > { %1250 = vmatprep.subr.bf16.mxu1 %v1355_v42  ;;  %1274 = vmatprep.subr.bf16.mxu0 %v1359_v50 }
  0x25   : > { %433 = vperm.xlu0 %1348, %v389_v28   ;;  %1275 = vmatpush3.bf16.msra.mxu0 %v1359_v50  ;;  %v1627_v2 = vrot.slane %v400_v62, %v483_v63  ;;  %p1377_p3 = pnand %p1376_p2, %p1370_p13 }
  0x26   : > { %438 = vperm.xlu1 %1349, %v390_v29   ;;  %1276 = vmatprep.subr.bf16.mxu0 %v1360_v51 }
  0x27   : > { %1251 = vmatpush3.bf16.msra.mxu1 %v1355_v42 }
  0x28   : > { %1252 = vmatprep.subr.bf16.mxu1 %v1356_v47 }
  0x29   : > { %443 = vperm.xlu0 %1348, %v391_v34   ;;  %1277 = vmatpush3.bf16.msra.mxu0 %v1360_v51 }
  0x2a   : > { %1235 = vmatmul.mubr.msk.bf16.gmra.mxu0 %vm507_vm0, %v378_v31  ;;  %448 = vperm.xlu1 %1349, %v392_v35  }
  0x2b   : > { %1238 = vmatprep.mubr.msk.bf16.mxu0 %vm507_vm0, %v379_v32  ;;  %1253 = vmatpush3.bf16.msra.mxu1 %v1356_v47 }
  0x2c   : > { %1254 = vmatprep.subr.bf16.mxu1 %v1357_v48  ;;  %1278 = vmatprep.subr.bf16.mxu0 %v1361_v52 }
  0x2d   : > { %453 = vperm.xlu0 %1348, %v393_v39   ;;  %1279 = vmatpush3.bf16.msra.mxu0 %v1361_v52 }
  0x2e   : > { %458 = vperm.xlu1 %1349, %v394_v40   ;;  %1280 = vmatprep.subr.bf16.mxu0 %v1362_v53 }
  0x2f   : > { %1255 = vmatpush3.bf16.msra.mxu1 %v1357_v48 }
  0x30   : > { %1256 = vmatprep.subr.bf16.mxu1 %v1358_v49 }
  0x31   : > { %463 = vperm.xlu0 %1348, %v395_v43   ;;  %1281 = vmatpush3.bf16.msra.mxu0 %v1362_v53 }
  0x32   : > { %1239 = vmatmul.mubr.msk.bf16.gmra.mxu0 %vm507_vm0, %v380_v41  ;;  %468 = vperm.xlu1 %1349, %v396_v44  }
  0x33   : > { %1257 = vmatpush3.bf16.msra.mxu1 %v1358_v49  ;;  %1282 = vmatprep.subr.bf16.mxu0 %v1363_v54 }
  0x35   : > { %473 = vperm.xlu0 %1348, %v397_v45   ;;  %1283 = vmatpush3.bf16.msra.mxu0 %v1363_v54 }
  0x36   : > { %478 = vperm.xlu1 %1349, %v398_v46  }
  0x94   : > { %v404_v55 = vpop.permute.xlu0 %403 }
  0x95   : > { %v414_v56 = vpop.permute.xlu1 %413  ;;  %v485_v3 = vmul.f32 %v1627_v2, %v404_v55 }
  0x96   : > { %v487_v5 = vmul.f32 %v1627_v2, %v414_v56 }
  0x98   : > { %v409_v58 = vpop.permute.xlu0 %408 }
  0x99   : > { %v419_v60 = vpop.permute.xlu1 %418  ;;  %v486_v13 = vmul.f32 %v1627_v2, %v409_v58 }
  0x9a   : > { %v488_v8 = vmul.f32 %v1627_v2, %v419_v60 }
  0x9c   : > { %v424_v0 = vpop.permute.xlu0 %423 }
  0x9d   : > { %v429_v1 = vpop.permute.xlu1 %428  ;;  %v489_v24 = vmul.f32 %v1627_v2, %v424_v0 }
  0x9e   : > { %v490_v38 = vmul.f32 %v1627_v2, %v429_v1 }
  0xa0   : > { %v434_v4 = vpop.permute.xlu0 %433 }
  0xa1   : > { %v439_v6 = vpop.permute.xlu1 %438  ;;  %v491_v26 = vmul.f32 %v1627_v2, %v434_v4 }
  0xa2   : > { %v492_v29 = vmul.f32 %v1627_v2, %v439_v6 }
  0xa4   : > { %v444_v14 = vpop.permute.xlu0 %443 }
  0xa5   : > { %v449_v17 = vpop.permute.xlu1 %448  ;;  %v493_v48 = vmul.f32 %v1627_v2, %v444_v14 }
  0xa6   : > { %v494_v62 = vmul.f32 %v1627_v2, %v449_v17 }
  0xa8   : > { %v454_v30 = vpop.permute.xlu0 %453 }
  0xa9   : > { %v459_v34 = vpop.permute.xlu1 %458  ;;  %v495_v51 = vmul.f32 %v1627_v2, %v454_v30 }
  0xaa   : > { %v496_v55 = vmul.f32 %v1627_v2, %v459_v34 }
  0xac   : > { %v464_v49 = vpop.permute.xlu0 %463 }
  0xad   : > { %v469_v52 = vpop.permute.xlu1 %468 }
  0xb0   : > { %v474_v4 = vpop.permute.xlu0 %473 }
  0xda   : > { %v1228_v7 = vpop.f32.mrf.mxu0 }
  0xdb   : > { %v575_v11 = vadd.f32 %v1228_v7, %v487_v5 }
  0xdc   : > { %v566_v9 = vpop.f32.mrf.mxu0 }
  0xdd   : > { %v567_v10 = vadd.f32 %v566_v9, %v485_v3  ;;  %v638_v22 = vadd.f32 %v1636_v15, %v575_v11  ;;  %v497_v11 = vmul.f32 %v1627_v2, %v464_v49 }
  0xde   : > { %v1229_v12 = vpop.f32.mrf.mxu0 }
  0xdf   : > { %v578_v16 = vadd.f32 %v1229_v12, %v488_v8  ;;  %v636_v21 = vadd.f32 %v1636_v15, %v567_v10  ;;  %v654_v35 = vmax.f32 %v638_v22, 0.0  ;;  %v479_v8 = vpop.permute.xlu1 %478 }
  0xe0   : > { %v569_v18 = vpop.f32.mrf.mxu0  ;;  %v500_v17 = vmul.f32 %v1627_v2, %v479_v8 }
  0xe1   : > { %v639_v19 = vadd.f32 %v1636_v15, %v578_v16  ;;  %v570_v20 = vadd.f32 %v569_v18, %v486_v13  ;;  %v652_v32 = vmax.f32 %v636_v21, 0.0  ;;  %v499_v13 = vmul.f32 %v1627_v2, %v474_v4 }
  0xe2   : > { %v1232_v23 = vpop.f32.mrf.mxu0 }
  0xe3   : > { %v637_v25 = vadd.f32 %v1636_v15, %v570_v20  ;;  %v655_v27 = vmax.f32 %v639_v19, 0.0  ;;  %v591_v36 = vadd.f32 %v1232_v23, %v491_v26 }
  0xe4   : > { %v582_v28 = vpop.f32.mrf.mxu0 }
  0xe5   : > { %v583_v31 = vadd.f32 %v582_v28, %v489_v24  ;;  %v653_v33 = vmax.f32 %v637_v25, 0.0  ;;  %v669_v42 = vpack.c.bf16 %v655_v27, %v654_v35  ;;  %v642_v46 = vadd.f32 %v1636_v15, %v591_v36 }
  0xe6   : > { %v1233_v37 = vpop.f32.mrf.mxu0  ;;  %v498_v24 = vmul.f32 %v1627_v2, %v469_v52 }
  0xe7   : > { %v594_v39 = vadd.f32 %v1233_v37, %v492_v29  ;;  %v668_v40 = vpack.c.bf16 %v653_v33, %v652_v32  ;;  %v640_v43 = vadd.f32 %v1636_v15, %v583_v31  ;;  %v658_v59 = vmax.f32 %v642_v46, 0.0 }
  0xe8   : > { %v585_v41 = vpop.f32.mrf.mxu0 }
  0xe9   : > { %v643_v44 = vadd.f32 %v1636_v15, %v594_v39  ;;  %v586_v45 = vadd.f32 %v585_v41, %v490_v38  ;;  %1258 = vmatprep.mubr.bf16.mxu1 %v668_v40  ;;  %v656_v56 = vmax.f32 %v640_v43, 0.0  ;;  %v1364_v39 = vld [vmem:[%s1760_s7 + $0x10] sm:$0xff]   ;;  %v1365_v40 = vld [vmem:[%s1760_s7 + $0x8] sm:$0xff]   ;;  %v1159_v43 = vld [vmem:[%s1759_s6] ss:$0 sm:$0xff] }
  0xea   : > { %v1236_v47 = vpop.f32.mrf.mxu0  ;;  %1259 = vmatmul.mubr.bf16.vlgmr.msra.gmra.mxu1 %v669_v42  ;;  %1284 = vmatprep.subr.bf16.mxu0 %v1364_v39 }
  0xeb   : > { %v641_v50 = vadd.f32 %v1636_v15, %v586_v45  ;;  %v659_v53 = vmax.f32 %v643_v44, 0.0  ;;  %v607_v60 = vadd.f32 %v1236_v47, %v495_v51  ;;  %1285 = vmatpush3.bf16.msra.mxu0 %v1364_v39 }
  0xec   : > { %v598_v54 = vpop.f32.mrf.mxu0  ;;  %1286 = vmatprep.subr.bf16.mxu0 %v1365_v40 }
  0xed   : > { %v657_v57 = vmax.f32 %v641_v50, 0.0  ;;  %v599_v58 = vadd.f32 %v598_v54, %v493_v48  ;;  %v671_v3 = vpack.c.bf16 %v659_v53, %v658_v59  ;;  %v646_v9 = vadd.f32 %v1636_v15, %v607_v60 }
  0xee   : > { %v1237_v61 = vpop.f32.mrf.mxu0 }
  0xef   : > { %v610_v63 = vadd.f32 %v1237_v61, %v496_v55  ;;  %v670_v0 = vpack.c.bf16 %v657_v57, %v656_v56  ;;  %v644_v5 = vadd.f32 %v1636_v15, %v599_v58  ;;  %v662_v21 = vmax.f32 %v646_v9, 0.0  ;;  %1287 = vmatpush3.bf16.msra.mxu0 %v1365_v40 }
  0xf0   : > { %v601_v1 = vpop.f32.mrf.mxu0 }
  0xf1   : > { %v647_v6 = vadd.f32 %v1636_v15, %v610_v63  ;;  %v602_v7 = vadd.f32 %v601_v1, %v494_v62  ;;  %1262 = vmatprep.mubr.bf16.mxu1 %v670_v0  ;;  %v660_v18 = vmax.f32 %v644_v5, 0.0 }
  0xf2   : > { %v1240_v10 = vpop.f32.mrf.mxu0  ;;  %1263 = vmatmul.mubr.bf16.gmra.mxu1 %v671_v3 }
  0xf3   : > { %v645_v12 = vadd.f32 %v1636_v15, %v602_v7  ;;  %v663_v14 = vmax.f32 %v647_v6, 0.0  ;;  %v623_v22 = vadd.f32 %v1240_v10, %v499_v13 }
  0xf4   : > { %v614_v16 = vpop.f32.mrf.mxu0 }
  0xf5   : > { %v661_v19 = vmax.f32 %v645_v12, 0.0  ;;  %v615_v20 = vadd.f32 %v614_v16, %v497_v11  ;;  %v673_v28 = vpack.c.bf16 %v663_v14, %v662_v21  ;;  %v650_v32 = vadd.f32 %v1636_v15, %v623_v22 }
  0xf6   : > { %v1241_v23 = vpop.f32.mrf.mxu0 }
  0xf7   : > { %v626_v25 = vadd.f32 %v1241_v23, %v500_v17  ;;  %v672_v26 = vpack.c.bf16 %v661_v19, %v660_v18  ;;  %v648_v29 = vadd.f32 %v1636_v15, %v615_v20  ;;  %v666_v37 = vmax.f32 %v650_v32, 0.0 }
  0xf8   : > { %v617_v27 = vpop.f32.mrf.mxu0 }
  0xf9   : > { %v651_v30 = vadd.f32 %v1636_v15, %v626_v25  ;;  %v618_v31 = vadd.f32 %v617_v27, %v498_v24  ;;  %1266 = vmatprep.mubr.bf16.mxu1 %v672_v26  ;;  %v664_v35 = vmax.f32 %v648_v29, 0.0 }
  0xfa   : > { %1267 = vmatmul.mubr.bf16.gmra.mxu1 %v673_v28 }
  0xfb   : > { %v649_v33 = vadd.f32 %v1636_v15, %v618_v31  ;;  %v667_v34 = vmax.f32 %v651_v30, 0.0  ;;  %v1366_v15 = vld [vmem:[%s1760_s7] sm:$0xff]  }
  0xfc   : > { %1288 = vmatprep.subr.bf16.mxu0 %v1366_v15 }
  0xfd   : > { %v665_v36 = vmax.f32 %v649_v33, 0.0  ;;  %v675_v38 = vpack.c.bf16 %v667_v34, %v666_v37  ;;  %1289 = vmatpush3.bf16.msra.mxu0 %v1366_v15 }
  0xff   : > { %v674_v2 = vpack.c.bf16 %v665_v36, %v664_v35  ;;  %v1168_v36 = vld [vmem:[%s1761_s8] ss:$0 sm:$0xff] }
 0x101   : > { %1270 = vmatprep.mubr.bf16.mxu1 %v674_v2 }
 0x102   : > { %1271 = vmatmul.mubr.bf16.gmra.mxu1 %v675_v38 }
 0x1aa   : > { %v1260_v41 = vpop.f32.mrf.mxu1 }
 0x1ab   : > { %v790_v47 = vadd.f32 %v1260_v41, %v1159_v43 }
 0x1ac   : > { %v781_v42 = vpop.f32.mrf.mxu1 }
 0x1ad   : > { %v782_v45 = vadd.f32 %v1159_v43, %v781_v42  ;;  %v846_v54 = vmax.f32 %v790_v47, 0.0 }
 0x1ae   : > { %v1261_v44 = vpop.f32.mrf.mxu1 }
 0x1af   : > { %v793_v46 = vadd.f32 %v1261_v44, %v1159_v43  ;;  %v844_v52 = vmax.f32 %v782_v45, 0.0 }
 0x1b0   : > { %v784_v48 = vpop.f32.mrf.mxu1 }
 0x1b1   : > { %v785_v49 = vadd.f32 %v1159_v43, %v784_v48  ;;  %v847_v50 = vmax.f32 %v793_v46, 0.0 }
 0x1b2   : > { %v1264_v51 = vpop.f32.mrf.mxu1 }
 0x1b3   : > { %v845_v53 = vmax.f32 %v785_v49, 0.0  ;;  %v861_v57 = vpack.c.bf16 %v847_v50, %v846_v54  ;;  %v806_v61 = vadd.f32 %v1264_v51, %v1159_v43 }
 0x1b4   : > { %v797_v55 = vpop.f32.mrf.mxu1 }
 0x1b5   : > { %v860_v56 = vpack.c.bf16 %v845_v53, %v844_v52  ;;  %v798_v59 = vadd.f32 %v1159_v43, %v797_v55  ;;  %v850_v5 = vmax.f32 %v806_v61, 0.0 }
 0x1b6   : > { %v1265_v58 = vpop.f32.mrf.mxu1 }
 0x1b7   : > { %v809_v60 = vadd.f32 %v1265_v58, %v1159_v43  ;;  %1290 = vmatprep.mubr.bf16.mxu0 %v860_v56  ;;  %v848_v3 = vmax.f32 %v798_v59, 0.0 }
 0x1b8   : > { %v800_v62 = vpop.f32.mrf.mxu1  ;;  %1291 = vmatmul.mubr.bf16.vlgmr.msra.gmra.mxu0 %v861_v57 }
 0x1b9   : > { %v801_v63 = vadd.f32 %v1159_v43, %v800_v62  ;;  %v851_v0 = vmax.f32 %v809_v60, 0.0 }
 0x1ba   : > { %v1268_v1 = vpop.f32.mrf.mxu1 }
 0x1bb   : > { %v849_v4 = vmax.f32 %v801_v63, 0.0  ;;  %v863_v8 = vpack.c.bf16 %v851_v0, %v850_v5  ;;  %v822_v12 = vadd.f32 %v1268_v1, %v1159_v43 }
 0x1bc   : > { %v813_v6 = vpop.f32.mrf.mxu1 }
 0x1bd   : > { %v862_v7 = vpack.c.bf16 %v849_v4, %v848_v3  ;;  %v814_v10 = vadd.f32 %v1159_v43, %v813_v6  ;;  %v854_v20 = vmax.f32 %v822_v12, 0.0 }
 0x1be   : > { %v1269_v9 = vpop.f32.mrf.mxu1 }
 0x1bf   : > { %v825_v11 = vadd.f32 %v1269_v9, %v1159_v43  ;;  %1294 = vmatprep.mubr.bf16.mxu0 %v862_v7  ;;  %v852_v18 = vmax.f32 %v814_v10, 0.0 }
 0x1c0   : > { %v816_v13 = vpop.f32.mrf.mxu1  ;;  %1295 = vmatmul.mubr.bf16.gmra.mxu0 %v863_v8 }
 0x1c1   : > { %v817_v14 = vadd.f32 %v1159_v43, %v816_v13  ;;  %v855_v16 = vmax.f32 %v825_v11, 0.0 }
 0x1c2   : > { %v1272_v17 = vpop.f32.mrf.mxu1 }
 0x1c3   : > { %v853_v19 = vmax.f32 %v817_v14, 0.0  ;;  %v865_v23 = vpack.c.bf16 %v855_v16, %v854_v20  ;;  %v838_v27 = vadd.f32 %v1272_v17, %v1159_v43 }
 0x1c4   : > { %v829_v21 = vpop.f32.mrf.mxu1 }
 0x1c5   : > { %v864_v22 = vpack.c.bf16 %v853_v19, %v852_v18  ;;  %v830_v25 = vadd.f32 %v1159_v43, %v829_v21  ;;  %v858_v33 = vmax.f32 %v838_v27, 0.0 }
 0x1c6   : > { %v1273_v24 = vpop.f32.mrf.mxu1 }
 0x1c7   : > { %v841_v26 = vadd.f32 %v1273_v24, %v1159_v43  ;;  %1298 = vmatprep.mubr.bf16.mxu0 %v864_v22  ;;  %v856_v31 = vmax.f32 %v830_v25, 0.0 }
 0x1c8   : > { %v832_v28 = vpop.f32.mrf.mxu1  ;;  %1299 = vmatmul.mubr.bf16.gmra.mxu0 %v865_v23 }
 0x1c9   : > { %v833_v29 = vadd.f32 %v1159_v43, %v832_v28  ;;  %v859_v30 = vmax.f32 %v841_v26, 0.0 }
 0x1cb   : > { %v857_v32 = vmax.f32 %v833_v29, 0.0  ;;  %v867_v35 = vpack.c.bf16 %v859_v30, %v858_v33 }
 0x1cd   : > { %v866_v34 = vpack.c.bf16 %v857_v32, %v856_v31 }
 0x1cf   : > { %1302 = vmatprep.mubr.bf16.mxu0 %v866_v34 }
 0x1d0   : > { %1303 = vmatmul.mubr.bf16.gmra.mxu0 %v867_v35 }
 0x278   : > { %v1292_v37 = vpop.f32.mrf.mxu0 }
 0x279   : > { %v982_v2 = vadd.f32 %v1292_v37, %v1168_v36 }
 0x27a   : > { %v973_v38 = vpop.f32.mrf.mxu0 }
 0x27b   : > { %1038 = vst [vmem:[%s1684_s25 + $0x10] sm:$0xff] %v982_v2  ;;  %v974_v39 = vadd.f32 %v1168_v36, %v973_v38 }
 0x27c   : > { %v1293_v40 = vpop.f32.mrf.mxu0 }
 0x27d   : > { %1036 = vst [vmem:[%s1684_s25] sm:$0xff] %v974_v39  ;;  %v985_v15 = vadd.f32 %v1293_v40, %v1168_v36 }
 0x27e   : > { %v976_v41 = vpop.f32.mrf.mxu0 }
 0x27f   : > { %1039 = vst [vmem:[%s1684_s25 + $0x18] sm:$0xff] %v985_v15  ;;  %v977_v42 = vadd.f32 %v1168_v36, %v976_v41 }
 0x280   : > { %v1296_v43 = vpop.f32.mrf.mxu0 }
 0x281   : > { %1037 = vst [vmem:[%s1684_s25 + $0x8] sm:$0xff] %v977_v42  ;;  %v998_v44 = vadd.f32 %v1296_v43, %v1168_v36 }
 0x282   : > { %v989_v45 = vpop.f32.mrf.mxu0 }
 0x283   : > { %1042 = vst [vmem:[%s1684_s25 + $0x30] sm:$0xff] %v998_v44  ;;  %v990_v46 = vadd.f32 %v1168_v36, %v989_v45 }
 0x284   : > { %v1297_v47 = vpop.f32.mrf.mxu0 }
 0x285   : > { %1040 = vst [vmem:[%s1684_s25 + $0x20] sm:$0xff] %v990_v46  ;;  %v1001_v48 = vadd.f32 %v1297_v47, %v1168_v36 }
 0x286   : > { %v992_v49 = vpop.f32.mrf.mxu0 }
 0x287   : > { %1043 = vst [vmem:[%s1684_s25 + $0x38] sm:$0xff] %v1001_v48  ;;  %v993_v50 = vadd.f32 %v1168_v36, %v992_v49 }
 0x288   : > { %v1300_v51 = vpop.f32.mrf.mxu0 }
 0x289   : > { %1041 = vst [vmem:[%s1684_s25 + $0x28] sm:$0xff] %v993_v50  ;;  %v1014_v52 = vadd.f32 %v1300_v51, %v1168_v36 }
 0x28a   : > { %v1005_v53 = vpop.f32.mrf.mxu0 }
 0x28b   : > { %1046 = vst [vmem:[%s1684_s25 + $0x50] sm:$0xff] %v1014_v52  ;;  %v1006_v54 = vadd.f32 %v1168_v36, %v1005_v53 }
 0x28c   : > { %v1301_v55 = vpop.f32.mrf.mxu0 }
 0x28d   : > { %1044 = vst [vmem:[%s1684_s25 + $0x40] sm:$0xff] %v1006_v54  ;;  %v1017_v56 = vadd.f32 %v1301_v55, %v1168_v36 }
 0x28e   : > { %v1008_v57 = vpop.f32.mrf.mxu0 }
 0x28f   : > { %1047 = vst [vmem:[%s1684_s25 + $0x58] sm:$0xff] %v1017_v56  ;;  %v1009_v58 = vadd.f32 %v1168_v36, %v1008_v57 }
 0x290   : > { %v1304_v59 = vpop.f32.mrf.mxu0 }
 0x291   : > { %1045 = vst [vmem:[%s1684_s25 + $0x48] sm:$0xff] %v1009_v58  ;;  %v1030_v60 = vadd.f32 %v1304_v59, %v1168_v36 }
 0x292   : > { %v1021_v61 = vpop.f32.mrf.mxu0 }
 0x293   : > { %1050 = vst [vmem:[%s1684_s25 + $0x70] sm:$0xff] %v1030_v60  ;;  %v1022_v62 = vadd.f32 %v1168_v36, %v1021_v61 }
 0x294   : > { %v1305_v63 = vpop.f32.mrf.mxu0 }
 0x295   : > { %1048 = vst [vmem:[%s1684_s25 + $0x60] sm:$0xff] %v1022_v62  ;;  %v1033_v0 = vadd.f32 %v1305_v63, %v1168_v36 }
 0x296   : > { %v1024_v1 = vpop.f32.mrf.mxu0 }
 0x297   : > { %1051 = vst [vmem:[%s1684_s25 + $0x78] sm:$0xff] %v1033_v0  ;;  %v1025_v3 = vadd.f32 %v1168_v36, %v1024_v1 }
 0x299   : > { %1049 = vst [vmem:[%s1684_s25 + $0x68] sm:$0xff] %v1025_v3 }
 0x29a   : > { %1380 = shalt.err (!%p1377_p3)
}
 0x29b   : > { %s1381_s22 = scalar_lea.hbm %s1705_s16, 2048  ;;  %s1385_s26 = scalar_lea.hbm %s1762_s9, 4096 }
 0x29c   : > { %p1382_p4 = scmp.ne.s32.totalorder %s1705_s16, %s1381_s22  ;;  %p1386_p9 = scmp.lt.s32.totalorder %s1705_s16, %s1762_s9 }
 0x29d   : > { %p1387_p10 = scmp.lt.s32.totalorder %s1385_s26, %s1381_s22 }
 0x29e   : > { %p1383_p7 = pnand %p1382_p4, %p1521_p5 }
 0x29f   : > { %p1388_p11 = por %p1387_p10, %p1386_p9 }
 0x2a0   : > { %p1384_p8 = pneg %p1383_p7 }
 0x2a2   : > { %p1389_p12 = pnand %p1388_p11, %p1384_p8 }
 0x2a4   : > { %1392 = shalt.err (!%p1389_p12)
}
 0x2a5   : > { %s1431_s17 = smov 128   ;;  %s1432_s21 = smov 8  }
 0x2a6   : > { %1306 = dma.vmem_to_hbm [thread:$0]  (%p1521_p5), %s1707_s28, 2048, %s1705_s16, %s1713_s13, %s1431_s17, %s1431_s17, %s1432_s21  }
 0x2a7 PF: > { %p1312_p13 = scmp.ge.s32.totalorder %s1427_s12, 2  ;;  %s1081_s23 = sand.u32 1, %s1415_s30  }
 0x2a8   : > { %s1082_s14 = scalar_lea.sflag [#allocation3], %s1081_s23 }
 0x2a9   : > { %p1309_p0 = pnand %p1312_p13, %p1525_p6 }
 0x2ab   : > { %p1310_p1 = pneg %p1309_p0 }
 0x2ad   : > { %1410 = dma.done.wait (%p1310_p1), %s1082_s14, 2048  }
 0x2ae   : > { %1412 = vsyncadd (%p1310_p1), %s1082_s14, 4294965248  ;;  %p19_p2 = scmp.ge.s32.totalorder %s1508_s15, 4   ;;  %s1765_s30 = smov %s1419_s10 }
 0x2af   : > { %s1766_s10 = smov %s1423_s11  ;;  %s1767_s11 = smov %s1519_s18 }
 0x2b0   : > { %s1768_s12 = smov %s1508_s15  ;;  %21 = sbr.rel (!%p19_p2) target bundleno = 3 (0x3), region = 94 }
 0x2b5   :  { %1087 = vsyncpa [#allocation3], 1 }
 0x2b6   :  { %1089 = vsyncpa [#allocation3 + $0x1], 1 }

</bundles_post_ra>
